<compile_context>
chip_gen: v7x
topology: tpu7x:2x2x1
jax: 0.10.0
libtpu: 0.0.40
codegen_flags: <defaults>
</compile_context>

<pallas_src>
import jax
import jax.numpy as jnp
from jax import lax
from jax.experimental import pallas as pl
from jax.experimental.pallas import tpu as pltpu

_BN_EPS = 1e-5
_VMEM_LIMIT = 32 * 1024 * 1024


# ------------------------------ Pallas kernels ------------------------------

def _im2col_conv(act, w_ref, b_ref, y_ref, st_ref, xp_ref, ic_ref):
    """SAME-padded 3x3 conv (+bias) of one image as a single im2col matmul,
    plus per-image partial BatchNorm statistics.

    act:    (hh, wh, cin) f32 activation for this image.
    w_ref:  (9*cin, cout) im2col-reshaped weights;  b_ref: (1, cout) bias.
    y_ref:  (1, hh, wh, cout) conv(+bias) output (pre-BN).
    st_ref: (1, 2, cout) per-image [sum; sum-of-squares] over hh*wh pixels.
    xp_ref: (hh+2, wh+2, cin) VMEM scratch (halo-padded activation).
    ic_ref: (hh, wh, 9*cin)   VMEM scratch (im2col rows).
    """
    hh, wh, cin = act.shape
    cout = w_ref.shape[1]

    # Zero only the 1-pixel halo border (interior is fully overwritten below).
    # Done every step -- cheap O(perimeter) work -- instead of only at
    # program_id == 0, so it remains correct when the batch axis is sharded
    # across TensorCores (each core owns its own scratch and may never run
    # grid step 0).
    zrow = jnp.zeros((1, wh + 2, cin), jnp.float32)
    zcol = jnp.zeros((hh + 2, 1, cin), jnp.float32)
    xp_ref[0:1, :, :] = zrow
    xp_ref[hh + 1:hh + 2, :, :] = zrow
    xp_ref[:, 0:1, :] = zcol
    xp_ref[:, wh + 1:wh + 2, :] = zcol
    xp_ref[1:hh + 1, 1:wh + 1, :] = act

    # Gather the 9 shifted 3x3-tap windows into im2col columns.  Every column
    # block [tap*cin, (tap+1)*cin) is written each step -> no scratch init.
    for ky in range(3):
        for kx in range(3):
            tap = ky * 3 + kx
            ic_ref[:, :, tap * cin:(tap + 1) * cin] = (
                xp_ref[ky:ky + hh, kx:kx + wh, :])

    # One MXU matmul: (hh*wh, 9*cin) x (9*cin, cout), f32 accumulation.
    ic = ic_ref[...].reshape(hh * wh, 9 * cin)
    acc = jnp.dot(ic, w_ref[...], preferred_element_type=jnp.float32)
    acc = acc + b_ref[...]

    y_ref[0] = acc.reshape(hh, wh, cout).astype(y_ref.dtype)

    # Per-image partial BatchNorm statistics, stored directly (no concat).
    st_ref[0, 0:1, :] = jnp.sum(acc, axis=0, keepdims=True)
    st_ref[0, 1:2, :] = jnp.sum(acc * acc, axis=0, keepdims=True)


def _pool_conv1_kernel(x_ref, w_ref, b_ref, y_ref, st_ref, xp_ref, ic_ref):
    """MaxPool2d(2) fused with conv1 (+bias) and partial BN stats."""
    cin = xp_ref.shape[2]
    x = x_ref[0]                                      # (hh, 2, wh, 2*cin)
    # 2x2 max pool: the W-direction pair lives in the lane dim, the
    # H-direction pair in a major dim -> two plain maximums.
    xw = jnp.maximum(x[..., :cin], x[..., cin:])      # (hh, 2, wh, cin)
    pooled = jnp.maximum(xw[:, 0], xw[:, 1])          # (hh, wh, cin)
    _im2col_conv(pooled, w_ref, b_ref, y_ref, st_ref, xp_ref, ic_ref)


def _bn_prelu_conv2_kernel(y1_ref, scale_ref, shift_ref, alpha_ref,
                           w_ref, b_ref, y2_ref, st_ref, xp_ref, ic_ref):
    """Folded BN1 (scale/shift) + PReLU1 applied on the fly, then conv2."""
    z = y1_ref[0] * scale_ref[...] + shift_ref[...]   # (hh, wh, c1)
    act = jnp.where(z >= 0.0, z, alpha_ref[...] * z)  # PReLU
    _im2col_conv(act, w_ref, b_ref, y2_ref, st_ref, xp_ref, ic_ref)


def _bn_prelu_kernel(y_ref, scale_ref, shift_ref, alpha_ref, o_ref):
    """Final folded BN (scale/shift) + PReLU, elementwise."""
    z = y_ref[...] * scale_ref[...] + shift_ref[...]
    o_ref[...] = jnp.where(z >= 0.0, z, alpha_ref[...] * z)


# ------------------------------ pallas_call wrappers ------------------------------

def _pool_conv1_call(x6, w_ic, b, hh, wh):
    n = x6.shape[0]
    cin2 = x6.shape[-1]
    cin = cin2 // 2
    k, cout = w_ic.shape
    flops = 2 * n * hh * wh * k * cout
    bytes_accessed = 4 * (x6.size + w_ic.size + b.size
                          + n * hh * wh * cout + n * 2 * cout)
    return pl.pallas_call(
        _pool_conv1_kernel,
        out_shape=(jax.ShapeDtypeStruct((n, hh, wh, cout), jnp.float32),
                   jax.ShapeDtypeStruct((n, 2, cout), jnp.float32)),
        grid_spec=pltpu.PrefetchScalarGridSpec(
            num_scalar_prefetch=0,
            grid=(n,),
            in_specs=[
                pl.BlockSpec((1, hh, 2, wh, cin2), lambda i: (i, 0, 0, 0, 0)),
                pl.BlockSpec((k, cout), lambda i: (0, 0)),
                pl.BlockSpec((1, cout), lambda i: (0, 0)),
            ],
            out_specs=(
                pl.BlockSpec((1, hh, wh, cout), lambda i: (i, 0, 0, 0)),
                pl.BlockSpec((1, 2, cout), lambda i: (i, 0, 0)),
            ),
            scratch_shapes=[
                pltpu.VMEM((hh + 2, wh + 2, cin), jnp.float32),
                pltpu.VMEM((hh, wh, 9 * cin), jnp.float32),
            ],
        ),
        compiler_params=pltpu.CompilerParams(
            dimension_semantics=("parallel",),
            vmem_limit_bytes=_VMEM_LIMIT),
        cost_estimate=pl.CostEstimate(flops=flops, transcendentals=0,
                                      bytes_accessed=bytes_accessed),
    )(x6, w_ic, b)


def _conv2_call(y1, scale, shift, alpha_vec, w_ic, b):
    n, hh, wh, c1 = y1.shape
    k, cout = w_ic.shape
    flops = 2 * n * hh * wh * k * cout
    bytes_accessed = 4 * (y1.size + 3 * c1 + w_ic.size + b.size
                          + n * hh * wh * cout + n * 2 * cout)
    return pl.pallas_call(
        _bn_prelu_conv2_kernel,
        out_shape=(jax.ShapeDtypeStruct((n, hh, wh, cout), jnp.float32),
                   jax.ShapeDtypeStruct((n, 2, cout), jnp.float32)),
        grid_spec=pltpu.PrefetchScalarGridSpec(
            num_scalar_prefetch=0,
            grid=(n,),
            in_specs=[
                pl.BlockSpec((1, hh, wh, c1), lambda i: (i, 0, 0, 0)),
                pl.BlockSpec((1, c1), lambda i: (0, 0)),
                pl.BlockSpec((1, c1), lambda i: (0, 0)),
                pl.BlockSpec((1, c1), lambda i: (0, 0)),
                pl.BlockSpec((k, cout), lambda i: (0, 0)),
                pl.BlockSpec((1, cout), lambda i: (0, 0)),
            ],
            out_specs=(
                pl.BlockSpec((1, hh, wh, cout), lambda i: (i, 0, 0, 0)),
                pl.BlockSpec((1, 2, cout), lambda i: (i, 0, 0)),
            ),
            scratch_shapes=[
                pltpu.VMEM((hh + 2, wh + 2, c1), jnp.float32),
                pltpu.VMEM((hh, wh, 9 * c1), jnp.float32),
            ],
        ),
        compiler_params=pltpu.CompilerParams(
            dimension_semantics=("parallel",),
            vmem_limit_bytes=_VMEM_LIMIT),
        cost_estimate=pl.CostEstimate(flops=flops, transcendentals=0,
                                      bytes_accessed=bytes_accessed),
    )(y1, scale, shift, alpha_vec, w_ic, b)


def _bn_prelu_call(y, scale, shift, alpha_vec):
    n, hh, wh, c = y.shape
    bytes_accessed = 4 * (2 * y.size + 3 * c)
    return pl.pallas_call(
        _bn_prelu_kernel,
        out_shape=jax.ShapeDtypeStruct((n, hh, wh, c), jnp.float32),
        grid_spec=pltpu.PrefetchScalarGridSpec(
            num_scalar_prefetch=0,
            grid=(n,),
            in_specs=[
                pl.BlockSpec((1, hh, wh, c), lambda i: (i, 0, 0, 0)),
                pl.BlockSpec((1, c), lambda i: (0, 0)),
                pl.BlockSpec((1, c), lambda i: (0, 0)),
                pl.BlockSpec((1, c), lambda i: (0, 0)),
            ],
            out_specs=pl.BlockSpec((1, hh, wh, c), lambda i: (i, 0, 0, 0)),
        ),
        compiler_params=pltpu.CompilerParams(
            dimension_semantics=("parallel",),
            vmem_limit_bytes=_VMEM_LIMIT),
        cost_estimate=pl.CostEstimate(flops=3 * y.size, transcendentals=0,
                                      bytes_accessed=bytes_accessed),
    )(y, scale, shift, alpha_vec)


# ------------------------------ host-side glue ------------------------------

def _im2col_weights(w_hwio):
    """(3, 3, cin, cout) -> (9*cin, cout); row order (ky, kx, cin) matches the
    im2col column order built inside the kernel."""
    kh, kw, cin, cout = w_hwio.shape
    assert kh == 3 and kw == 3
    k = kh * kw * cin
    assert k <= 128, "single-matmul im2col path assumes 9*Cin <= 128"
    return w_hwio.reshape(k, cout)


def _bn_fold_scale_shift(stats, gamma, beta, count):
    """Fold training-mode BatchNorm (biased variance) into scale/shift."""
    s = jnp.sum(stats[:, 0, :], axis=0)
    ss = jnp.sum(stats[:, 1, :], axis=0)
    mean = s / count
    var = jnp.maximum(ss / count - mean * mean, 0.0)
    scale = gamma * lax.rsqrt(var + _BN_EPS)
    shift = beta - mean * scale
    c = scale.shape[0]
    return scale.reshape(1, c), shift.reshape(1, c)


def down_forward(x_nchw, params):
    n, cin, h, w = x_nchw.shape
    assert h % 2 == 0 and w % 2 == 0, "MaxPool2d(2) needs even spatial dims"
    hh, wh = h // 2, w // 2

    w1, b1, g1, be1, a1 = params["conv1"]
    w2, b2, g2, be2, a2 = params["conv2"]
    cout = w1.shape[-1]

    # NCHW -> NHWC with the TRUE channel count (tiny XLA transpose; no HBM lane
    # padding).  The reshape exposes the 2x2 pool structure: the W-direction
    # pair folds into the last (lane) dim, the H-direction pair into a major
    # dim, so the kernel pools with two plain maximums.
    x = jnp.transpose(x_nchw, (0, 2, 3, 1)).astype(jnp.float32)
    x6 = x.reshape(n, hh, 2, wh, 2 * cin)

    w1_ic = _im2col_weights(w1)                  # (9*cin,  cout)
    w2_ic = _im2col_weights(w2)                  # (9*cout, cout)
    b1r = b1.reshape(1, cout)
    b2r = b2.reshape(1, cout)
    a1v = jnp.full((1, cout), a1, jnp.float32)
    a2v = jnp.full((1, cout), a2, jnp.float32)

    count = n * hh * wh

    # Layer 1: fused maxpool + conv1(+bias) + per-image partial BN stats.
    y1, st1 = _pool_conv1_call(x6, w1_ic, b1r, hh, wh)
    sc1, sh1 = _bn_fold_scale_shift(st1, g1, be1, count)
    # Layer 2: BN1 + PReLU1 applied on the fly while producing conv2 (+stats).
    y2, st2 = _conv2_call(y1, sc1, sh1, a1v, w2_ic, b2r)
    sc2, sh2 = _bn_fold_scale_shift(st2, g2, be2, count)
    # Final BN2 + PReLU2 (elementwise), true channel count.
    out = _bn_prelu_call(y2, sc2, sh2, a2v)      # (n, hh, wh, cout)

    # NHWC -> NCHW on the true-channel tensor (~KBs; no padded HBM sweep).
    return jnp.transpose(out, (0, 3, 1, 2))


# ------------------------------ params & reference ------------------------------

def init_conv_layer_params(key, cin, cout):
    k0, k1, k2, k3 = jax.random.split(key, 4)
    w = jax.random.normal(k0, (3, 3, cin, cout), jnp.float32) / jnp.sqrt(9.0 * cin)
    b = 0.05 * jax.random.normal(k1, (cout,), jnp.float32)
    gamma = 1.0 + 0.1 * jax.random.normal(k2, (cout,), jnp.float32)
    beta = 0.1 * jax.random.normal(k3, (cout,), jnp.float32)
    alpha = jnp.float32(0.25)                    # nn.PReLU() default
    return (w, b, gamma, beta, alpha)


def down_reference(x_nchw, params):
    """Pure-JAX reference of the same forward pass (correctness check)."""
    x = jnp.transpose(x_nchw, (0, 2, 3, 1))
    x = lax.reduce_window(x, -jnp.inf, lax.max, (1, 2, 2, 1), (1, 2, 2, 1), "VALID")
    for w, b, gamma, beta, alpha in (params["conv1"], params["conv2"]):
        y = lax.conv_general_dilated(
            x, w, (1, 1), "SAME",
            dimension_numbers=("NHWC", "HWIO", "NHWC"),
            precision=lax.Precision.HIGHEST) + b
        mean = jnp.mean(y, axis=(0, 1, 2), keepdims=True)
        var = jnp.mean((y - mean) ** 2, axis=(0, 1, 2), keepdims=True)
        y = (y - mean) * lax.rsqrt(var + _BN_EPS) * gamma + beta
        x = jnp.where(y >= 0.0, y, alpha * y)
    return jnp.transpose(x, (0, 3, 1, 2))


# ------------------------------ main ------------------------------

if __name__ == "__main__":
    N, Cin, Cout, H, W = 2, 4, 8, 16, 16
    key = jax.random.PRNGKey(0)
    k_x, k_1, k_2 = jax.random.split(key, 3)
    x = jax.random.normal(k_x, (N, Cin, H, W), jnp.float32)
    params = {
        "conv1": init_conv_layer_params(k_1, Cin, Cout),
        "conv2": init_conv_layer_params(k_2, Cout, Cout),
    }

    out = jax.block_until_ready(jax.jit(down_forward)(x, params))

    assert out.shape == (N, Cout, H // 2, W // 2), out.shape
    ref = down_reference(x, params)
    if not bool(jnp.allclose(out, ref, rtol=1e-3, atol=1e-3)):
        err = float(jnp.max(jnp.abs(out - ref)))
        raise AssertionError(
            f"Pallas output does not match JAX reference (max abs err {err})")
    print("KERNEL_OK")
</pallas_src>

<mosaic_0001>
module attributes {stable_mosaic.version = 11 : i64} {
  func.func @_pool_conv1_kernel(%arg0: i32, %arg1: memref<1x8x2x8x8xf32, #tpu.memory_space<vmem>>, %arg2: memref<36x8xf32, #tpu.memory_space<vmem>>, %arg3: memref<1x8xf32, #tpu.memory_space<vmem>>, %arg4: memref<1x8x8x8xf32, #tpu.memory_space<vmem>>, %arg5: memref<1x2x8xf32, #tpu.memory_space<vmem>>, %arg6: memref<10x10x4xf32, #tpu.memory_space<vmem>>, %arg7: memref<8x8x36xf32, #tpu.memory_space<vmem>>) attributes {dimension_semantics = [#tpu.dimension_semantics<parallel>], iteration_bounds = array<i64: 2>, scalar_prefetch = 0 : i64, scratch_operands = 2 : i64, tpu.core_type = #tpu.core_type<tc>, window_params = [{transform_indices = @transform_0, window_bounds = array<i64: 1, 8, 2, 8, 8>}, {pipeline_mode = #tpu.pipeline_mode<synchronous>, transform_indices = @transform_1, window_bounds = array<i64: 36, 8>}, {pipeline_mode = #tpu.pipeline_mode<synchronous>, transform_indices = @transform_2, window_bounds = array<i64: 1, 8>}, {transform_indices = @transform_3, window_bounds = array<i64: 1, 8, 8, 8>}, {transform_indices = @transform_4, window_bounds = array<i64: 1, 2, 8>}]} {
    %c0 = arith.constant 0 : index
    %c0_0 = arith.constant 0 : index
    %c0_1 = arith.constant 0 : index
    %c0_2 = arith.constant 0 : index
    %c0_3 = arith.constant 0 : index
    %0 = vector.load %arg1[%c0, %c0_0, %c0_1, %c0_2, %c0_3] : memref<1x8x2x8x8xf32, #tpu.memory_space<vmem>>, vector<1x8x2x8x8xf32>
    %1 = vector.shape_cast %0 : vector<1x8x2x8x8xf32> to vector<8x2x8x8xf32>
    %2 = vector.extract_strided_slice %1 {offsets = [0, 0, 0, 0], sizes = [8, 2, 8, 4], strides = [1, 1, 1, 1]} : vector<8x2x8x8xf32> to vector<8x2x8x4xf32>
    %3 = vector.extract_strided_slice %1 {offsets = [0, 0, 0, 4], sizes = [8, 2, 8, 4], strides = [1, 1, 1, 1]} : vector<8x2x8x8xf32> to vector<8x2x8x4xf32>
    %4 = arith.maximumf %2, %3 : vector<8x2x8x4xf32>
    %5 = vector.extract_strided_slice %4 {offsets = [0, 0, 0, 0], sizes = [8, 1, 8, 4], strides = [1, 1, 1, 1]} : vector<8x2x8x4xf32> to vector<8x1x8x4xf32>
    %6 = vector.shape_cast %5 : vector<8x1x8x4xf32> to vector<8x8x4xf32>
    %7 = vector.extract_strided_slice %4 {offsets = [0, 1, 0, 0], sizes = [8, 1, 8, 4], strides = [1, 1, 1, 1]} : vector<8x2x8x4xf32> to vector<8x1x8x4xf32>
    %8 = vector.shape_cast %7 : vector<8x1x8x4xf32> to vector<8x8x4xf32>
    %9 = arith.maximumf %6, %8 : vector<8x8x4xf32>
    %cst = arith.constant 0.000000e+00 : f32
    %10 = vector.broadcast %cst : f32 to vector<1x10x4xf32>
    %cst_4 = arith.constant 0.000000e+00 : f32
    %11 = vector.broadcast %cst_4 : f32 to vector<10x1x4xf32>
    %c0_5 = arith.constant 0 : index
    %c0_6 = arith.constant 0 : index
    %c0_7 = arith.constant 0 : index
    %12 = vector.load %arg6[%c0_5, %c0_6, %c0_7] : memref<10x10x4xf32, #tpu.memory_space<vmem>>, vector<1x10x4xf32>
    tpu.vector_store %arg6[%c0_5, %c0_6, %c0_7], %10 {strides = array<i32>} : memref<10x10x4xf32, #tpu.memory_space<vmem>>, vector<1x10x4xf32>,
    %c9 = arith.constant 9 : index
    %c0_8 = arith.constant 0 : index
    %c0_9 = arith.constant 0 : index
    %13 = vector.load %arg6[%c9, %c0_8, %c0_9] : memref<10x10x4xf32, #tpu.memory_space<vmem>>, vector<1x10x4xf32>
    tpu.vector_store %arg6[%c9, %c0_8, %c0_9], %10 {strides = array<i32>} : memref<10x10x4xf32, #tpu.memory_space<vmem>>, vector<1x10x4xf32>,
    %c0_10 = arith.constant 0 : index
    %c0_11 = arith.constant 0 : index
    %c0_12 = arith.constant 0 : index
    %14 = vector.load %arg6[%c0_10, %c0_11, %c0_12] : memref<10x10x4xf32, #tpu.memory_space<vmem>>, vector<10x1x4xf32>
    tpu.vector_store %arg6[%c0_10, %c0_11, %c0_12], %11 {strides = array<i32>} : memref<10x10x4xf32, #tpu.memory_space<vmem>>, vector<10x1x4xf32>,
    %c0_13 = arith.constant 0 : index
    %c9_14 = arith.constant 9 : index
    %c0_15 = arith.constant 0 : index
    %15 = vector.load %arg6[%c0_13, %c9_14, %c0_15] : memref<10x10x4xf32, #tpu.memory_space<vmem>>, vector<10x1x4xf32>
    tpu.vector_store %arg6[%c0_13, %c9_14, %c0_15], %11 {strides = array<i32>} : memref<10x10x4xf32, #tpu.memory_space<vmem>>, vector<10x1x4xf32>,
    %c1 = arith.constant 1 : index
    %c1_16 = arith.constant 1 : index
    %c0_17 = arith.constant 0 : index
    %16 = vector.load %arg6[%c1, %c1_16, %c0_17] : memref<10x10x4xf32, #tpu.memory_space<vmem>>, vector<8x8x4xf32>
    tpu.vector_store %arg6[%c1, %c1_16, %c0_17], %9 {strides = array<i32>} : memref<10x10x4xf32, #tpu.memory_space<vmem>>, vector<8x8x4xf32>,
    %c0_18 = arith.constant 0 : index
    %c0_19 = arith.constant 0 : index
    %c0_20 = arith.constant 0 : index
    %17 = vector.load %arg6[%c0_18, %c0_19, %c0_20] : memref<10x10x4xf32, #tpu.memory_space<vmem>>, vector<8x8x4xf32>
    %c0_21 = arith.constant 0 : index
    %c0_22 = arith.constant 0 : index
    %c0_23 = arith.constant 0 : index
    %18 = vector.load %arg7[%c0_21, %c0_22, %c0_23] : memref<8x8x36xf32, #tpu.memory_space<vmem>>, vector<8x8x4xf32>
    tpu.vector_store %arg7[%c0_21, %c0_22, %c0_23], %17 {strides = array<i32>} : memref<8x8x36xf32, #tpu.memory_space<vmem>>, vector<8x8x4xf32>,
    %c0_24 = arith.constant 0 : index
    %c1_25 = arith.constant 1 : index
    %c0_26 = arith.constant 0 : index
    %19 = vector.load %arg6[%c0_24, %c1_25, %c0_26] : memref<10x10x4xf32, #tpu.memory_space<vmem>>, vector<8x8x4xf32>
    %c0_27 = arith.constant 0 : index
    %c0_28 = arith.constant 0 : index
    %c4 = arith.constant 4 : index
    %20 = vector.load %arg7[%c0_27, %c0_28, %c4] : memref<8x8x36xf32, #tpu.memory_space<vmem>>, vector<8x8x4xf32>
    tpu.vector_store %arg7[%c0_27, %c0_28, %c4], %19 {strides = array<i32>} : memref<8x8x36xf32, #tpu.memory_space<vmem>>, vector<8x8x4xf32>,
    %c0_29 = arith.constant 0 : index
    %c2 = arith.constant 2 : index
    %c0_30 = arith.constant 0 : index
    %21 = vector.load %arg6[%c0_29, %c2, %c0_30] : memref<10x10x4xf32, #tpu.memory_space<vmem>>, vector<8x8x4xf32>
    %c0_31 = arith.constant 0 : index
    %c0_32 = arith.constant 0 : index
    %c8 = arith.constant 8 : index
    %22 = vector.load %arg7[%c0_31, %c0_32, %c8] : memref<8x8x36xf32, #tpu.memory_space<vmem>>, vector<8x8x4xf32>
    tpu.vector_store %arg7[%c0_31, %c0_32, %c8], %21 {strides = array<i32>} : memref<8x8x36xf32, #tpu.memory_space<vmem>>, vector<8x8x4xf32>,
    %c1_33 = arith.constant 1 : index
    %c0_34 = arith.constant 0 : index
    %c0_35 = arith.constant 0 : index
    %23 = vector.load %arg6[%c1_33, %c0_34, %c0_35] : memref<10x10x4xf32, #tpu.memory_space<vmem>>, vector<8x8x4xf32>
    %c0_36 = arith.constant 0 : index
    %c0_37 = arith.constant 0 : index
    %c12 = arith.constant 12 : index
    %24 = vector.load %arg7[%c0_36, %c0_37, %c12] : memref<8x8x36xf32, #tpu.memory_space<vmem>>, vector<8x8x4xf32>
    tpu.vector_store %arg7[%c0_36, %c0_37, %c12], %23 {strides = array<i32>} : memref<8x8x36xf32, #tpu.memory_space<vmem>>, vector<8x8x4xf32>,
    %c1_38 = arith.constant 1 : index
    %c1_39 = arith.constant 1 : index
    %c0_40 = arith.constant 0 : index
    %25 = vector.load %arg6[%c1_38, %c1_39, %c0_40] : memref<10x10x4xf32, #tpu.memory_space<vmem>>, vector<8x8x4xf32>
    %c0_41 = arith.constant 0 : index
    %c0_42 = arith.constant 0 : index
    %c16 = arith.constant 16 : index
    %26 = vector.load %arg7[%c0_41, %c0_42, %c16] : memref<8x8x36xf32, #tpu.memory_space<vmem>>, vector<8x8x4xf32>
    tpu.vector_store %arg7[%c0_41, %c0_42, %c16], %25 {strides = array<i32>} : memref<8x8x36xf32, #tpu.memory_space<vmem>>, vector<8x8x4xf32>,
    %c1_43 = arith.constant 1 : index
    %c2_44 = arith.constant 2 : index
    %c0_45 = arith.constant 0 : index
    %27 = vector.load %arg6[%c1_43, %c2_44, %c0_45] : memref<10x10x4xf32, #tpu.memory_space<vmem>>, vector<8x8x4xf32>
    %c0_46 = arith.constant 0 : index
    %c0_47 = arith.constant 0 : index
    %c20 = arith.constant 20 : index
    %28 = vector.load %arg7[%c0_46, %c0_47, %c20] : memref<8x8x36xf32, #tpu.memory_space<vmem>>, vector<8x8x4xf32>
    tpu.vector_store %arg7[%c0_46, %c0_47, %c20], %27 {strides = array<i32>} : memref<8x8x36xf32, #tpu.memory_space<vmem>>, vector<8x8x4xf32>,
    %c2_48 = arith.constant 2 : index
    %c0_49 = arith.constant 0 : index
    %c0_50 = arith.constant 0 : index
    %29 = vector.load %arg6[%c2_48, %c0_49, %c0_50] : memref<10x10x4xf32, #tpu.memory_space<vmem>>, vector<8x8x4xf32>
    %c0_51 = arith.constant 0 : index
    %c0_52 = arith.constant 0 : index
    %c24 = arith.constant 24 : index
    %30 = vector.load %arg7[%c0_51, %c0_52, %c24] : memref<8x8x36xf32, #tpu.memory_space<vmem>>, vector<8x8x4xf32>
    tpu.vector_store %arg7[%c0_51, %c0_52, %c24], %29 {strides = array<i32>} : memref<8x8x36xf32, #tpu.memory_space<vmem>>, vector<8x8x4xf32>,
    %c2_53 = arith.constant 2 : index
    %c1_54 = arith.constant 1 : index
    %c0_55 = arith.constant 0 : index
    %31 = vector.load %arg6[%c2_53, %c1_54, %c0_55] : memref<10x10x4xf32, #tpu.memory_space<vmem>>, vector<8x8x4xf32>
    %c0_56 = arith.constant 0 : index
    %c0_57 = arith.constant 0 : index
    %c28 = arith.constant 28 : index
    %32 = vector.load %arg7[%c0_56, %c0_57, %c28] : memref<8x8x36xf32, #tpu.memory_space<vmem>>, vector<8x8x4xf32>
    tpu.vector_store %arg7[%c0_56, %c0_57, %c28], %31 {strides = array<i32>} : memref<8x8x36xf32, #tpu.memory_space<vmem>>, vector<8x8x4xf32>,
    %c2_58 = arith.constant 2 : index
    %c2_59 = arith.constant 2 : index
    %c0_60 = arith.constant 0 : index
    %33 = vector.load %arg6[%c2_58, %c2_59, %c0_60] : memref<10x10x4xf32, #tpu.memory_space<vmem>>, vector<8x8x4xf32>
    %c0_61 = arith.constant 0 : index
    %c0_62 = arith.constant 0 : index
    %c32 = arith.constant 32 : index
    %34 = vector.load %arg7[%c0_61, %c0_62, %c32] : memref<8x8x36xf32, #tpu.memory_space<vmem>>, vector<8x8x4xf32>
    tpu.vector_store %arg7[%c0_61, %c0_62, %c32], %33 {strides = array<i32>} : memref<8x8x36xf32, #tpu.memory_space<vmem>>, vector<8x8x4xf32>,
    %c0_63 = arith.constant 0 : index
    %c0_64 = arith.constant 0 : index
    %c0_65 = arith.constant 0 : index
    %35 = vector.load %arg7[%c0_63, %c0_64, %c0_65] : memref<8x8x36xf32, #tpu.memory_space<vmem>>, vector<8x8x36xf32>
    %36 = vector.shape_cast %35 : vector<8x8x36xf32> to vector<64x36xf32>
    %c0_66 = arith.constant 0 : index
    %c0_67 = arith.constant 0 : index
    %37 = vector.load %arg2[%c0_66, %c0_67] : memref<36x8xf32, #tpu.memory_space<vmem>>, vector<36x8xf32>
    %cst_68 = arith.constant dense<0.000000e+00> : vector<64x8xf32>
    %38 = tpu.matmul %36, %37, %cst_68 {dimension_numbers = #tpu.dot_dimension_numbers<[1], [0], [0], [1], [0, 0, 1, 1], [], []>} : vector<64x36xf32>, vector<36x8xf32>, vector<64x8xf32> -> vector<64x8xf32>
    %c0_69 = arith.constant 0 : index
    %c0_70 = arith.constant 0 : index
    %39 = vector.load %arg3[%c0_69, %c0_70] : memref<1x8xf32, #tpu.memory_space<vmem>>, vector<1x8xf32>
    %40 = vector.broadcast %39 : vector<1x8xf32> to vector<64x8xf32>
    %41 = arith.addf %38, %40 : vector<64x8xf32>
    %42 = vector.shape_cast %41 : vector<64x8xf32> to vector<8x8x8xf32>
    %c0_71 = arith.constant 0 : index
    %c0_72 = arith.constant 0 : index
    %c0_73 = arith.constant 0 : index
    %c0_74 = arith.constant 0 : index
    %43 = vector.load %arg4[%c0_71, %c0_72, %c0_73, %c0_74] : memref<1x8x8x8xf32, #tpu.memory_space<vmem>>, vector<1x8x8x8xf32>
    %44 = vector.shape_cast %43 : vector<1x8x8x8xf32> to vector<8x8x8xf32>
    %45 = vector.shape_cast %42 : vector<8x8x8xf32> to vector<1x8x8x8xf32>
    tpu.vector_store %arg4[%c0_71, %c0_72, %c0_73, %c0_74], %45 {strides = array<i32>} : memref<1x8x8x8xf32, #tpu.memory_space<vmem>>, vector<1x8x8x8xf32>,
    %cst_75 = arith.constant dense<0.000000e+00> : vector<8xf32>
    %46 = vector.multi_reduction <add>, %41, %cst_75 [0] : vector<64x8xf32> to vector<8xf32>
    %47 = vector.shape_cast %46 : vector<8xf32> to vector<1x8xf32>
    %c0_76 = arith.constant 0 : index
    %c0_77 = arith.constant 0 : index
    %c0_78 = arith.constant 0 : index
    %48 = vector.load %arg5[%c0_76, %c0_77, %c0_78] : memref<1x2x8xf32, #tpu.memory_space<vmem>>, vector<1x1x8xf32>
    %49 = vector.shape_cast %48 : vector<1x1x8xf32> to vector<1x8xf32>
    %50 = vector.shape_cast %47 : vector<1x8xf32> to vector<1x1x8xf32>
    tpu.vector_store %arg5[%c0_76, %c0_77, %c0_78], %50 {strides = array<i32>} : memref<1x2x8xf32, #tpu.memory_space<vmem>>, vector<1x1x8xf32>,
    %51 = arith.mulf %41, %41 : vector<64x8xf32>
    %cst_79 = arith.constant dense<0.000000e+00> : vector<8xf32>
    %52 = vector.multi_reduction <add>, %51, %cst_79 [0] : vector<64x8xf32> to vector<8xf32>
    %53 = vector.shape_cast %52 : vector<8xf32> to vector<1x8xf32>
    %c0_80 = arith.constant 0 : index
    %c1_81 = arith.constant 1 : index
    %c0_82 = arith.constant 0 : index
    %54 = vector.load %arg5[%c0_80, %c1_81, %c0_82] : memref<1x2x8xf32, #tpu.memory_space<vmem>>, vector<1x1x8xf32>
    %55 = vector.shape_cast %54 : vector<1x1x8xf32> to vector<1x8xf32>
    %56 = vector.shape_cast %53 : vector<1x8xf32> to vector<1x1x8xf32>
    tpu.vector_store %arg5[%c0_80, %c1_81, %c0_82], %56 {strides = array<i32>} : memref<1x2x8xf32, #tpu.memory_space<vmem>>, vector<1x1x8xf32>,
    return
  }
  func.func @transform_0(%arg0: i32) -> (i32, i32, i32, i32, i32) {
    %c0_i32 = arith.constant 0 : i32
    %c0_i32_0 = arith.constant 0 : i32
    %c0_i32_1 = arith.constant 0 : i32
    %c0_i32_2 = arith.constant 0 : i32
    %c0_i32_3 = arith.constant 0 : i32
    return %arg0, %c0_i32, %c0_i32_0, %c0_i32_1, %c0_i32_2 : i32, i32, i32, i32, i32
  }
  func.func @transform_1(%arg0: i32) -> (i32, i32) {
    %c0_i32 = arith.constant 0 : i32
    %c0_i32_0 = arith.constant 0 : i32
    %c0_i32_1 = arith.constant 0 : i32
    return %c0_i32, %c0_i32_0 : i32, i32
  }
  func.func @transform_2(%arg0: i32) -> (i32, i32) {
    %c0_i32 = arith.constant 0 : i32
    %c0_i32_0 = arith.constant 0 : i32
    %c0_i32_1 = arith.constant 0 : i32
    return %c0_i32, %c0_i32_0 : i32, i32
  }
  func.func @transform_3(%arg0: i32) -> (i32, i32, i32, i32) {
    %c0_i32 = arith.constant 0 : i32
    %c0_i32_0 = arith.constant 0 : i32
    %c0_i32_1 = arith.constant 0 : i32
    %c0_i32_2 = arith.constant 0 : i32
    return %arg0, %c0_i32, %c0_i32_0, %c0_i32_1 : i32, i32, i32, i32
  }
  func.func @transform_4(%arg0: i32) -> (i32, i32, i32) {
    %c0_i32 = arith.constant 0 : i32
    %c0_i32_0 = arith.constant 0 : i32
    %c0_i32_1 = arith.constant 0 : i32
    return %arg0, %c0_i32, %c0_i32_0 : i32, i32, i32
  }
}

module attributes {stable_mosaic.version = 11 : i64} {
  func.func @_bn_prelu_kernel(%arg0: i32, %arg1: memref<1x8x8x8xf32, #tpu.memory_space<vmem>>, %arg2: memref<1x8xf32, #tpu.memory_space<vmem>>, %arg3: memref<1x8xf32, #tpu.memory_space<vmem>>, %arg4: memref<1x8xf32, #tpu.memory_space<vmem>>, %arg5: memref<1x8x8x8xf32, #tpu.memory_space<vmem>>) attributes {dimension_semantics = [#tpu.dimension_semantics<parallel>], iteration_bounds = array<i64: 2>, scalar_prefetch = 0 : i64, scratch_operands = 0 : i64, tpu.core_type = #tpu.core_type<tc>, window_params = [{transform_indices = @transform_0, window_bounds = array<i64: 1, 8, 8, 8>}, {pipeline_mode = #tpu.pipeline_mode<synchronous>, transform_indices = @transform_1, window_bounds = array<i64: 1, 8>}, {pipeline_mode = #tpu.pipeline_mode<synchronous>, transform_indices = @transform_2, window_bounds = array<i64: 1, 8>}, {pipeline_mode = #tpu.pipeline_mode<synchronous>, transform_indices = @transform_3, window_bounds = array<i64: 1, 8>}, {transform_indices = @transform_4, window_bounds = array<i64: 1, 8, 8, 8>}]} {
    %c0 = arith.constant 0 : index
    %c0_0 = arith.constant 0 : index
    %c0_1 = arith.constant 0 : index
    %c0_2 = arith.constant 0 : index
    %0 = vector.load %arg1[%c0, %c0_0, %c0_1, %c0_2] : memref<1x8x8x8xf32, #tpu.memory_space<vmem>>, vector<1x8x8x8xf32>
    %c0_3 = arith.constant 0 : index
    %c0_4 = arith.constant 0 : index
    %1 = vector.load %arg2[%c0_3, %c0_4] : memref<1x8xf32, #tpu.memory_space<vmem>>, vector<1x8xf32>
    %2 = vector.shape_cast %1 : vector<1x8xf32> to vector<1x1x1x8xf32>
    %3 = vector.broadcast %2 : vector<1x1x1x8xf32> to vector<1x8x8x8xf32>
    %4 = arith.mulf %0, %3 : vector<1x8x8x8xf32>
    %c0_5 = arith.constant 0 : index
    %c0_6 = arith.constant 0 : index
    %5 = vector.load %arg3[%c0_5, %c0_6] : memref<1x8xf32, #tpu.memory_space<vmem>>, vector<1x8xf32>
    %6 = vector.shape_cast %5 : vector<1x8xf32> to vector<1x1x1x8xf32>
    %7 = vector.broadcast %6 : vector<1x1x1x8xf32> to vector<1x8x8x8xf32>
    %8 = arith.addf %4, %7 : vector<1x8x8x8xf32>
    %cst = arith.constant 0.000000e+00 : f32
    %9 = vector.broadcast %cst : f32 to vector<1x8x8x8xf32>
    %10 = arith.cmpf oge, %8, %9 : vector<1x8x8x8xf32>
    %c0_7 = arith.constant 0 : index
    %c0_8 = arith.constant 0 : index
    %11 = vector.load %arg4[%c0_7, %c0_8] : memref<1x8xf32, #tpu.memory_space<vmem>>, vector<1x8xf32>
    %12 = vector.shape_cast %11 : vector<1x8xf32> to vector<1x1x1x8xf32>
    %13 = vector.broadcast %12 : vector<1x1x1x8xf32> to vector<1x8x8x8xf32>
    %14 = arith.mulf %13, %8 : vector<1x8x8x8xf32>
    %15 = arith.select %10, %8, %14 : vector<1x8x8x8xi1>, vector<1x8x8x8xf32>
    %c0_9 = arith.constant 0 : index
    %c0_10 = arith.constant 0 : index
    %c0_11 = arith.constant 0 : index
    %c0_12 = arith.constant 0 : index
    %16 = vector.load %arg5[%c0_9, %c0_10, %c0_11, %c0_12] : memref<1x8x8x8xf32, #tpu.memory_space<vmem>>, vector<1x8x8x8xf32>
    tpu.vector_store %arg5[%c0_9, %c0_10, %c0_11, %c0_12], %15 {strides = array<i32>} : memref<1x8x8x8xf32, #tpu.memory_space<vmem>>, vector<1x8x8x8xf32>,
    return
  }
  func.func @transform_0(%arg0: i32) -> (i32, i32, i32, i32) {
    %c0_i32 = arith.constant 0 : i32
    %c0_i32_0 = arith.constant 0 : i32
    %c0_i32_1 = arith.constant 0 : i32
    %c0_i32_2 = arith.constant 0 : i32
    return %arg0, %c0_i32, %c0_i32_0, %c0_i32_1 : i32, i32, i32, i32
  }
  func.func @transform_1(%arg0: i32) -> (i32, i32) {
    %c0_i32 = arith.constant 0 : i32
    %c0_i32_0 = arith.constant 0 : i32
    %c0_i32_1 = arith.constant 0 : i32
    return %c0_i32, %c0_i32_0 : i32, i32
  }
  func.func @transform_2(%arg0: i32) -> (i32, i32) {
    %c0_i32 = arith.constant 0 : i32
    %c0_i32_0 = arith.constant 0 : i32
    %c0_i32_1 = arith.constant 0 : i32
    return %c0_i32, %c0_i32_0 : i32, i32
  }
  func.func @transform_3(%arg0: i32) -> (i32, i32) {
    %c0_i32 = arith.constant 0 : i32
    %c0_i32_0 = arith.constant 0 : i32
    %c0_i32_1 = arith.constant 0 : i32
    return %c0_i32, %c0_i32_0 : i32, i32
  }
  func.func @transform_4(%arg0: i32) -> (i32, i32, i32, i32) {
    %c0_i32 = arith.constant 0 : i32
    %c0_i32_0 = arith.constant 0 : i32
    %c0_i32_1 = arith.constant 0 : i32
    %c0_i32_2 = arith.constant 0 : i32
    return %arg0, %c0_i32, %c0_i32_0, %c0_i32_1 : i32, i32, i32, i32
  }
}

module attributes {stable_mosaic.version = 11 : i64} {
  func.func @_bn_prelu_conv2_kernel(%arg0: i32, %arg1: memref<1x8x8x8xf32, #tpu.memory_space<vmem>>, %arg2: memref<1x8xf32, #tpu.memory_space<vmem>>, %arg3: memref<1x8xf32, #tpu.memory_space<vmem>>, %arg4: memref<1x8xf32, #tpu.memory_space<vmem>>, %arg5: memref<72x8xf32, #tpu.memory_space<vmem>>, %arg6: memref<1x8xf32, #tpu.memory_space<vmem>>, %arg7: memref<1x8x8x8xf32, #tpu.memory_space<vmem>>, %arg8: memref<1x2x8xf32, #tpu.memory_space<vmem>>, %arg9: memref<10x10x8xf32, #tpu.memory_space<vmem>>, %arg10: memref<8x8x72xf32, #tpu.memory_space<vmem>>) attributes {dimension_semantics = [#tpu.dimension_semantics<parallel>], iteration_bounds = array<i64: 2>, scalar_prefetch = 0 : i64, scratch_operands = 2 : i64, tpu.core_type = #tpu.core_type<tc>, window_params = [{transform_indices = @transform_0, window_bounds = array<i64: 1, 8, 8, 8>}, {pipeline_mode = #tpu.pipeline_mode<synchronous>, transform_indices = @transform_1, window_bounds = array<i64: 1, 8>}, {pipeline_mode = #tpu.pipeline_mode<synchronous>, transform_indices = @transform_2, window_bounds = array<i64: 1, 8>}, {pipeline_mode = #tpu.pipeline_mode<synchronous>, transform_indices = @transform_3, window_bounds = array<i64: 1, 8>}, {pipeline_mode = #tpu.pipeline_mode<synchronous>, transform_indices = @transform_4, window_bounds = array<i64: 72, 8>}, {pipeline_mode = #tpu.pipeline_mode<synchronous>, transform_indices = @transform_5, window_bounds = array<i64: 1, 8>}, {transform_indices = @transform_6, window_bounds = array<i64: 1, 8, 8, 8>}, {transform_indices = @transform_7, window_bounds = array<i64: 1, 2, 8>}]} {
    %c0 = arith.constant 0 : index
    %c0_0 = arith.constant 0 : index
    %c0_1 = arith.constant 0 : index
    %c0_2 = arith.constant 0 : index
    %0 = vector.load %arg1[%c0, %c0_0, %c0_1, %c0_2] : memref<1x8x8x8xf32, #tpu.memory_space<vmem>>, vector<1x8x8x8xf32>
    %1 = vector.shape_cast %0 : vector<1x8x8x8xf32> to vector<8x8x8xf32>
    %c0_3 = arith.constant 0 : index
    %c0_4 = arith.constant 0 : index
    %2 = vector.load %arg2[%c0_3, %c0_4] : memref<1x8xf32, #tpu.memory_space<vmem>>, vector<1x8xf32>
    %3 = vector.shape_cast %2 : vector<1x8xf32> to vector<1x1x8xf32>
    %4 = vector.broadcast %3 : vector<1x1x8xf32> to vector<8x8x8xf32>
    %5 = arith.mulf %1, %4 : vector<8x8x8xf32>
    %c0_5 = arith.constant 0 : index
    %c0_6 = arith.constant 0 : index
    %6 = vector.load %arg3[%c0_5, %c0_6] : memref<1x8xf32, #tpu.memory_space<vmem>>, vector<1x8xf32>
    %7 = vector.shape_cast %6 : vector<1x8xf32> to vector<1x1x8xf32>
    %8 = vector.broadcast %7 : vector<1x1x8xf32> to vector<8x8x8xf32>
    %9 = arith.addf %5, %8 : vector<8x8x8xf32>
    %cst = arith.constant 0.000000e+00 : f32
    %10 = vector.broadcast %cst : f32 to vector<8x8x8xf32>
    %11 = arith.cmpf oge, %9, %10 : vector<8x8x8xf32>
    %c0_7 = arith.constant 0 : index
    %c0_8 = arith.constant 0 : index
    %12 = vector.load %arg4[%c0_7, %c0_8] : memref<1x8xf32, #tpu.memory_space<vmem>>, vector<1x8xf32>
    %13 = vector.shape_cast %12 : vector<1x8xf32> to vector<1x1x8xf32>
    %14 = vector.broadcast %13 : vector<1x1x8xf32> to vector<8x8x8xf32>
    %15 = arith.mulf %14, %9 : vector<8x8x8xf32>
    %16 = arith.select %11, %9, %15 : vector<8x8x8xi1>, vector<8x8x8xf32>
    %cst_9 = arith.constant 0.000000e+00 : f32
    %17 = vector.broadcast %cst_9 : f32 to vector<1x10x8xf32>
    %cst_10 = arith.constant 0.000000e+00 : f32
    %18 = vector.broadcast %cst_10 : f32 to vector<10x1x8xf32>
    %c0_11 = arith.constant 0 : index
    %c0_12 = arith.constant 0 : index
    %c0_13 = arith.constant 0 : index
    %19 = vector.load %arg9[%c0_11, %c0_12, %c0_13] : memref<10x10x8xf32, #tpu.memory_space<vmem>>, vector<1x10x8xf32>
    tpu.vector_store %arg9[%c0_11, %c0_12, %c0_13], %17 {strides = array<i32>} : memref<10x10x8xf32, #tpu.memory_space<vmem>>, vector<1x10x8xf32>,
    %c9 = arith.constant 9 : index
    %c0_14 = arith.constant 0 : index
    %c0_15 = arith.constant 0 : index
    %20 = vector.load %arg9[%c9, %c0_14, %c0_15] : memref<10x10x8xf32, #tpu.memory_space<vmem>>, vector<1x10x8xf32>
    tpu.vector_store %arg9[%c9, %c0_14, %c0_15], %17 {strides = array<i32>} : memref<10x10x8xf32, #tpu.memory_space<vmem>>, vector<1x10x8xf32>,
    %c0_16 = arith.constant 0 : index
    %c0_17 = arith.constant 0 : index
    %c0_18 = arith.constant 0 : index
    %21 = vector.load %arg9[%c0_16, %c0_17, %c0_18] : memref<10x10x8xf32, #tpu.memory_space<vmem>>, vector<10x1x8xf32>
    tpu.vector_store %arg9[%c0_16, %c0_17, %c0_18], %18 {strides = array<i32>} : memref<10x10x8xf32, #tpu.memory_space<vmem>>, vector<10x1x8xf32>,
    %c0_19 = arith.constant 0 : index
    %c9_20 = arith.constant 9 : index
    %c0_21 = arith.constant 0 : index
    %22 = vector.load %arg9[%c0_19, %c9_20, %c0_21] : memref<10x10x8xf32, #tpu.memory_space<vmem>>, vector<10x1x8xf32>
    tpu.vector_store %arg9[%c0_19, %c9_20, %c0_21], %18 {strides = array<i32>} : memref<10x10x8xf32, #tpu.memory_space<vmem>>, vector<10x1x8xf32>,
    %c1 = arith.constant 1 : index
    %c1_22 = arith.constant 1 : index
    %c0_23 = arith.constant 0 : index
    %23 = vector.load %arg9[%c1, %c1_22, %c0_23] : memref<10x10x8xf32, #tpu.memory_space<vmem>>, vector<8x8x8xf32>
    tpu.vector_store %arg9[%c1, %c1_22, %c0_23], %16 {strides = array<i32>} : memref<10x10x8xf32, #tpu.memory_space<vmem>>, vector<8x8x8xf32>,
    %c0_24 = arith.constant 0 : index
    %c0_25 = arith.constant 0 : index
    %c0_26 = arith.constant 0 : index
    %24 = vector.load %arg9[%c0_24, %c0_25, %c0_26] : memref<10x10x8xf32, #tpu.memory_space<vmem>>, vector<8x8x8xf32>
    %c0_27 = arith.constant 0 : index
    %c0_28 = arith.constant 0 : index
    %c0_29 = arith.constant 0 : index
    %25 = vector.load %arg10[%c0_27, %c0_28, %c0_29] : memref<8x8x72xf32, #tpu.memory_space<vmem>>, vector<8x8x8xf32>
    tpu.vector_store %arg10[%c0_27, %c0_28, %c0_29], %24 {strides = array<i32>} : memref<8x8x72xf32, #tpu.memory_space<vmem>>, vector<8x8x8xf32>,
    %c0_30 = arith.constant 0 : index
    %c1_31 = arith.constant 1 : index
    %c0_32 = arith.constant 0 : index
    %26 = vector.load %arg9[%c0_30, %c1_31, %c0_32] : memref<10x10x8xf32, #tpu.memory_space<vmem>>, vector<8x8x8xf32>
    %c0_33 = arith.constant 0 : index
    %c0_34 = arith.constant 0 : index
    %c8 = arith.constant 8 : index
    %27 = vector.load %arg10[%c0_33, %c0_34, %c8] : memref<8x8x72xf32, #tpu.memory_space<vmem>>, vector<8x8x8xf32>
    tpu.vector_store %arg10[%c0_33, %c0_34, %c8], %26 {strides = array<i32>} : memref<8x8x72xf32, #tpu.memory_space<vmem>>, vector<8x8x8xf32>,
    %c0_35 = arith.constant 0 : index
    %c2 = arith.constant 2 : index
    %c0_36 = arith.constant 0 : index
    %28 = vector.load %arg9[%c0_35, %c2, %c0_36] : memref<10x10x8xf32, #tpu.memory_space<vmem>>, vector<8x8x8xf32>
    %c0_37 = arith.constant 0 : index
    %c0_38 = arith.constant 0 : index
    %c16 = arith.constant 16 : index
    %29 = vector.load %arg10[%c0_37, %c0_38, %c16] : memref<8x8x72xf32, #tpu.memory_space<vmem>>, vector<8x8x8xf32>
    tpu.vector_store %arg10[%c0_37, %c0_38, %c16], %28 {strides = array<i32>} : memref<8x8x72xf32, #tpu.memory_space<vmem>>, vector<8x8x8xf32>,
    %c1_39 = arith.constant 1 : index
    %c0_40 = arith.constant 0 : index
    %c0_41 = arith.constant 0 : index
    %30 = vector.load %arg9[%c1_39, %c0_40, %c0_41] : memref<10x10x8xf32, #tpu.memory_space<vmem>>, vector<8x8x8xf32>
    %c0_42 = arith.constant 0 : index
    %c0_43 = arith.constant 0 : index
    %c24 = arith.constant 24 : index
    %31 = vector.load %arg10[%c0_42, %c0_43, %c24] : memref<8x8x72xf32, #tpu.memory_space<vmem>>, vector<8x8x8xf32>
    tpu.vector_store %arg10[%c0_42, %c0_43, %c24], %30 {strides = array<i32>} : memref<8x8x72xf32, #tpu.memory_space<vmem>>, vector<8x8x8xf32>,
    %c1_44 = arith.constant 1 : index
    %c1_45 = arith.constant 1 : index
    %c0_46 = arith.constant 0 : index
    %32 = vector.load %arg9[%c1_44, %c1_45, %c0_46] : memref<10x10x8xf32, #tpu.memory_space<vmem>>, vector<8x8x8xf32>
    %c0_47 = arith.constant 0 : index
    %c0_48 = arith.constant 0 : index
    %c32 = arith.constant 32 : index
    %33 = vector.load %arg10[%c0_47, %c0_48, %c32] : memref<8x8x72xf32, #tpu.memory_space<vmem>>, vector<8x8x8xf32>
    tpu.vector_store %arg10[%c0_47, %c0_48, %c32], %32 {strides = array<i32>} : memref<8x8x72xf32, #tpu.memory_space<vmem>>, vector<8x8x8xf32>,
    %c1_49 = arith.constant 1 : index
    %c2_50 = arith.constant 2 : index
    %c0_51 = arith.constant 0 : index
    %34 = vector.load %arg9[%c1_49, %c2_50, %c0_51] : memref<10x10x8xf32, #tpu.memory_space<vmem>>, vector<8x8x8xf32>
    %c0_52 = arith.constant 0 : index
    %c0_53 = arith.constant 0 : index
    %c40 = arith.constant 40 : index
    %35 = vector.load %arg10[%c0_52, %c0_53, %c40] : memref<8x8x72xf32, #tpu.memory_space<vmem>>, vector<8x8x8xf32>
    tpu.vector_store %arg10[%c0_52, %c0_53, %c40], %34 {strides = array<i32>} : memref<8x8x72xf32, #tpu.memory_space<vmem>>, vector<8x8x8xf32>,
    %c2_54 = arith.constant 2 : index
    %c0_55 = arith.constant 0 : index
    %c0_56 = arith.constant 0 : index
    %36 = vector.load %arg9[%c2_54, %c0_55, %c0_56] : memref<10x10x8xf32, #tpu.memory_space<vmem>>, vector<8x8x8xf32>
    %c0_57 = arith.constant 0 : index
    %c0_58 = arith.constant 0 : index
    %c48 = arith.constant 48 : index
    %37 = vector.load %arg10[%c0_57, %c0_58, %c48] : memref<8x8x72xf32, #tpu.memory_space<vmem>>, vector<8x8x8xf32>
    tpu.vector_store %arg10[%c0_57, %c0_58, %c48], %36 {strides = array<i32>} : memref<8x8x72xf32, #tpu.memory_space<vmem>>, vector<8x8x8xf32>,
    %c2_59 = arith.constant 2 : index
    %c1_60 = arith.constant 1 : index
    %c0_61 = arith.constant 0 : index
    %38 = vector.load %arg9[%c2_59, %c1_60, %c0_61] : memref<10x10x8xf32, #tpu.memory_space<vmem>>, vector<8x8x8xf32>
    %c0_62 = arith.constant 0 : index
    %c0_63 = arith.constant 0 : index
    %c56 = arith.constant 56 : index
    %39 = vector.load %arg10[%c0_62, %c0_63, %c56] : memref<8x8x72xf32, #tpu.memory_space<vmem>>, vector<8x8x8xf32>
    tpu.vector_store %arg10[%c0_62, %c0_63, %c56], %38 {strides = array<i32>} : memref<8x8x72xf32, #tpu.memory_space<vmem>>, vector<8x8x8xf32>,
    %c2_64 = arith.constant 2 : index
    %c2_65 = arith.constant 2 : index
    %c0_66 = arith.constant 0 : index
    %40 = vector.load %arg9[%c2_64, %c2_65, %c0_66] : memref<10x10x8xf32, #tpu.memory_space<vmem>>, vector<8x8x8xf32>
    %c0_67 = arith.constant 0 : index
    %c0_68 = arith.constant 0 : index
    %c64 = arith.constant 64 : index
    %41 = vector.load %arg10[%c0_67, %c0_68, %c64] : memref<8x8x72xf32, #tpu.memory_space<vmem>>, vector<8x8x8xf32>
    tpu.vector_store %arg10[%c0_67, %c0_68, %c64], %40 {strides = array<i32>} : memref<8x8x72xf32, #tpu.memory_space<vmem>>, vector<8x8x8xf32>,
    %c0_69 = arith.constant 0 : index
    %c0_70 = arith.constant 0 : index
    %c0_71 = arith.constant 0 : index
    %42 = vector.load %arg10[%c0_69, %c0_70, %c0_71] : memref<8x8x72xf32, #tpu.memory_space<vmem>>, vector<8x8x72xf32>
    %43 = vector.shape_cast %42 : vector<8x8x72xf32> to vector<64x72xf32>
    %c0_72 = arith.constant 0 : index
    %c0_73 = arith.constant 0 : index
    %44 = vector.load %arg5[%c0_72, %c0_73] : memref<72x8xf32, #tpu.memory_space<vmem>>, vector<72x8xf32>
    %cst_74 = arith.constant dense<0.000000e+00> : vector<64x8xf32>
    %45 = tpu.matmul %43, %44, %cst_74 {dimension_numbers = #tpu.dot_dimension_numbers<[1], [0], [0], [1], [0, 0, 1, 1], [], []>} : vector<64x72xf32>, vector<72x8xf32>, vector<64x8xf32> -> vector<64x8xf32>
    %c0_75 = arith.constant 0 : index
    %c0_76 = arith.constant 0 : index
    %46 = vector.load %arg6[%c0_75, %c0_76] : memref<1x8xf32, #tpu.memory_space<vmem>>, vector<1x8xf32>
    %47 = vector.broadcast %46 : vector<1x8xf32> to vector<64x8xf32>
    %48 = arith.addf %45, %47 : vector<64x8xf32>
    %49 = vector.shape_cast %48 : vector<64x8xf32> to vector<8x8x8xf32>
    %c0_77 = arith.constant 0 : index
    %c0_78 = arith.constant 0 : index
    %c0_79 = arith.constant 0 : index
    %c0_80 = arith.constant 0 : index
    %50 = vector.load %arg7[%c0_77, %c0_78, %c0_79, %c0_80] : memref<1x8x8x8xf32, #tpu.memory_space<vmem>>, vector<1x8x8x8xf32>
    %51 = vector.shape_cast %50 : vector<1x8x8x8xf32> to vector<8x8x8xf32>
    %52 = vector.shape_cast %49 : vector<8x8x8xf32> to vector<1x8x8x8xf32>
    tpu.vector_store %arg7[%c0_77, %c0_78, %c0_79, %c0_80], %52 {strides = array<i32>} : memref<1x8x8x8xf32, #tpu.memory_space<vmem>>, vector<1x8x8x8xf32>,
    %cst_81 = arith.constant dense<0.000000e+00> : vector<8xf32>
    %53 = vector.multi_reduction <add>, %48, %cst_81 [0] : vector<64x8xf32> to vector<8xf32>
    %54 = vector.shape_cast %53 : vector<8xf32> to vector<1x8xf32>
    %c0_82 = arith.constant 0 : index
    %c0_83 = arith.constant 0 : index
    %c0_84 = arith.constant 0 : index
    %55 = vector.load %arg8[%c0_82, %c0_83, %c0_84] : memref<1x2x8xf32, #tpu.memory_space<vmem>>, vector<1x1x8xf32>
    %56 = vector.shape_cast %55 : vector<1x1x8xf32> to vector<1x8xf32>
    %57 = vector.shape_cast %54 : vector<1x8xf32> to vector<1x1x8xf32>
    tpu.vector_store %arg8[%c0_82, %c0_83, %c0_84], %57 {strides = array<i32>} : memref<1x2x8xf32, #tpu.memory_space<vmem>>, vector<1x1x8xf32>,
    %58 = arith.mulf %48, %48 : vector<64x8xf32>
    %cst_85 = arith.constant dense<0.000000e+00> : vector<8xf32>
    %59 = vector.multi_reduction <add>, %58, %cst_85 [0] : vector<64x8xf32> to vector<8xf32>
    %60 = vector.shape_cast %59 : vector<8xf32> to vector<1x8xf32>
    %c0_86 = arith.constant 0 : index
    %c1_87 = arith.constant 1 : index
    %c0_88 = arith.constant 0 : index
    %61 = vector.load %arg8[%c0_86, %c1_87, %c0_88] : memref<1x2x8xf32, #tpu.memory_space<vmem>>, vector<1x1x8xf32>
    %62 = vector.shape_cast %61 : vector<1x1x8xf32> to vector<1x8xf32>
    %63 = vector.shape_cast %60 : vector<1x8xf32> to vector<1x1x8xf32>
    tpu.vector_store %arg8[%c0_86, %c1_87, %c0_88], %63 {strides = array<i32>} : memref<1x2x8xf32, #tpu.memory_space<vmem>>, vector<1x1x8xf32>,
    return
  }
  func.func @transform_0(%arg0: i32) -> (i32, i32, i32, i32) {
    %c0_i32 = arith.constant 0 : i32
    %c0_i32_0 = arith.constant 0 : i32
    %c0_i32_1 = arith.constant 0 : i32
    %c0_i32_2 = arith.constant 0 : i32
    return %arg0, %c0_i32, %c0_i32_0, %c0_i32_1 : i32, i32, i32, i32
  }
  func.func @transform_1(%arg0: i32) -> (i32, i32) {
    %c0_i32 = arith.constant 0 : i32
    %c0_i32_0 = arith.constant 0 : i32
    %c0_i32_1 = arith.constant 0 : i32
    return %c0_i32, %c0_i32_0 : i32, i32
  }
  func.func @transform_2(%arg0: i32) -> (i32, i32) {
    %c0_i32 = arith.constant 0 : i32
    %c0_i32_0 = arith.constant 0 : i32
    %c0_i32_1 = arith.constant 0 : i32
    return %c0_i32, %c0_i32_0 : i32, i32
  }
  func.func @transform_3(%arg0: i32) -> (i32, i32) {
    %c0_i32 = arith.constant 0 : i32
    %c0_i32_0 = arith.constant 0 : i32
    %c0_i32_1 = arith.constant 0 : i32
    return %c0_i32, %c0_i32_0 : i32, i32
  }
  func.func @transform_4(%arg0: i32) -> (i32, i32) {
    %c0_i32 = arith.constant 0 : i32
    %c0_i32_0 = arith.constant 0 : i32
    %c0_i32_1 = arith.constant 0 : i32
    return %c0_i32, %c0_i32_0 : i32, i32
  }
  func.func @transform_5(%arg0: i32) -> (i32, i32) {
    %c0_i32 = arith.constant 0 : i32
    %c0_i32_0 = arith.constant 0 : i32
    %c0_i32_1 = arith.constant 0 : i32
    return %c0_i32, %c0_i32_0 : i32, i32
  }
  func.func @transform_6(%arg0: i32) -> (i32, i32, i32, i32) {
    %c0_i32 = arith.constant 0 : i32
    %c0_i32_0 = arith.constant 0 : i32
    %c0_i32_1 = arith.constant 0 : i32
    %c0_i32_2 = arith.constant 0 : i32
    return %arg0, %c0_i32, %c0_i32_0, %c0_i32_1 : i32, i32, i32, i32
  }
  func.func @transform_7(%arg0: i32) -> (i32, i32, i32) {
    %c0_i32 = arith.constant 0 : i32
    %c0_i32_0 = arith.constant 0 : i32
    %c0_i32_1 = arith.constant 0 : i32
    return %arg0, %c0_i32, %c0_i32_0 : i32, i32, i32
  }
}

</mosaic_0001>

<bundles_post_ra>
// kernel: down_forward.5
= control target key start
LH: loop header
LB: loop body
LE: loop exit
PB: predicated region body
PF: predicated region fallthrough
CT: control target
= control target key end

     0   :  { %s388_s15 = smov 0   ;;  %s435_s0 = inlined_call_operand.vmem [shape: f32[2,8,8,8], index: 0, kind: input, shape index: {}]   ;;  %s436_s1 = inlined_call_operand.vmem [shape: f32[1,8], index: 1, kind: input, shape index: {}]   ;;  %s437_s2 = inlined_call_operand.vmem [shape: f32[1,8], index: 2, kind: input, shape index: {}]   ;;  %s438_s3 = inlined_call_operand.vmem [shape: f32[1,8], index: 3, kind: input, shape index: {}]   ;;  %s439_s4 = inlined_call_operand.vmem [shape: f32[2,8,8,8], index: 4, kind: output, shape index: {}]  }
   0x1 LB: > { %s331_s16 = sadd.s32 4294967295, %s361_s15   ;;  %p335_p0 = scmp.ge.s32.totalorder %s361_s15, 1  ;;  %s361_s15 = sphi %s388_s15, %s14_s15  }
   0x2   : > { %p162_p1 = scmp.lt.s32.totalorder %s361_s15, 3 }
   0x4   : > { %p163_p2 = pnand %p335_p0, %p162_p1 }
   0x5   : > { %p188_p3 = scmp.lt.s32.totalorder (!%p163_p2), %s331_s16, 1  ;;  %v340_v0 = vld [vmem:[%s436_s1] ss:$0 sm:$0xff] (!%p163_p2)  ;;  %vm267_vm0 = vcmask (!%p163_p2), 64512  }
   0x6   : > { %166 = sbr.rel (%p163_p2) target bundleno = 31 (0x1f), region = 36  ;;  %v341_v1 = vld [vmem:[%s437_s2] ss:$0 sm:$0xff] (!%p163_p2) }
   0x7   : > { %v342_v11 = vld [vmem:[%s438_s3] ss:$0 sm:$0xff] (!%p163_p2) }
   0xd   : > { %s441_s16 = smov (!%p188_p3, %s331_s16), 1 }
   0xe   : > { %s345_s17 = sshll.u32 %s441_s16, 6 }
   0xf   : > { %s192_s22 = scalar_lea.vmem %s435_s0, %s345_s17  ;;  %s414_s29 = scalar_lea.vmem %s439_s4, %s345_s17 }
  0x10   : > { %v198_v2 = vld [vmem:[%s192_s22] sm:$0xff]  ;;  %v199_v3 = vld [vmem:[%s192_s22 + $0x8] sm:$0xff]  ;;  %v200_v4 = vld [vmem:[%s192_s22 + $0x10] sm:$0xff] }
  0x11   : > { %v213_v5 = vmul.f32 %v340_v0, %v198_v2  ;;  %v214_v6 = vmul.f32 %v340_v0, %v199_v3  ;;  %v215_v7 = vmul.f32 %v340_v0, %v200_v4  ;;  %v201_v8 = vld [vmem:[%s192_s22 + $0x18] sm:$0xff]  ;;  %v202_v9 = vld [vmem:[%s192_s22 + $0x20] sm:$0xff]  ;;  %v203_v10 = vld [vmem:[%s192_s22 + $0x28] sm:$0xff] }
  0x12   : > { %v216_v12 = vmul.f32 %v340_v0, %v201_v8  ;;  %v217_v13 = vmul.f32 %v340_v0, %v202_v9  ;;  %v218_v14 = vmul.f32 %v340_v0, %v203_v10  ;;  %v204_v15 = vld [vmem:[%s192_s22 + $0x30] sm:$0xff]  ;;  %v205_v16 = vld [vmem:[%s192_s22 + $0x38] sm:$0xff] }
  0x13   : > { %v228_v17 = vadd.f32 %v341_v1, %v213_v5  ;;  %v229_v18 = vadd.f32 %v341_v1, %v214_v6  ;;  %v230_v19 = vadd.f32 %v341_v1, %v215_v7  ;;  %v219_v20 = vmul.f32 %v340_v0, %v204_v15 }
  0x14   : > { %v231_v21 = vadd.f32 %v341_v1, %v216_v12  ;;  %v232_v22 = vadd.f32 %v341_v1, %v217_v13  ;;  %v233_v23 = vadd.f32 %v341_v1, %v218_v14  ;;  %v220_v24 = vmul.f32 %v340_v0, %v205_v16 }
  0x15   : > { %vm236_vm1 = vcmp.ge.f32.partialorder %v228_v17, 0.0  ;;  %v251_v25 = vmul.f32 %v342_v11, %v228_v17  ;;  %vm237_vm2 = vcmp.ge.f32.partialorder %v229_v18, 0.0  ;;  %v252_v26 = vmul.f32 %v342_v11, %v229_v18 }
  0x16   : > { %vm238_vm3 = vcmp.ge.f32.partialorder %v230_v19, 0.0  ;;  %v253_v27 = vmul.f32 %v342_v11, %v230_v19  ;;  %vm239_vm4 = vcmp.ge.f32.partialorder %v231_v21, 0.0  ;;  %v254_v28 = vmul.f32 %v342_v11, %v231_v21 }
  0x17   : > { %v259_v29 = vsel %vm236_vm1, %v228_v17, %v251_v25  ;;  %v260_v30 = vsel %vm237_vm2, %v229_v18, %v252_v26  ;;  %vm240_vm5 = vcmp.ge.f32.partialorder %v232_v22, 0.0  ;;  %v255_v31 = vmul.f32 %v342_v11, %v232_v22 }
  0x18   : > { %268 = vst.msk [vmem:[%s414_s29] sm:$0xff] %vm267_vm0, %v259_v29  ;;  %269 = vst.msk [vmem:[%s414_s29 + $0x8] sm:$0xff] %vm267_vm0, %v260_v30  ;;  %v261_v32 = vsel %vm238_vm3, %v230_v19, %v253_v27  ;;  %v262_v33 = vsel %vm239_vm4, %v231_v21, %v254_v28  ;;  %vm241_vm6 = vcmp.ge.f32.partialorder %v233_v23, 0.0  ;;  %v256_v34 = vmul.f32 %v342_v11, %v233_v23 }
  0x19   : > { %270 = vst.msk [vmem:[%s414_s29 + $0x10] sm:$0xff] %vm267_vm0, %v261_v32  ;;  %271 = vst.msk [vmem:[%s414_s29 + $0x18] sm:$0xff] %vm267_vm0, %v262_v33  ;;  %v263_v35 = vsel %vm240_vm5, %v232_v22, %v255_v31  ;;  %v234_v36 = vadd.f32 %v341_v1, %v219_v20  ;;  %v235_v37 = vadd.f32 %v341_v1, %v220_v24 }
  0x1a   : > { %272 = vst.msk [vmem:[%s414_s29 + $0x20] sm:$0xff] %vm267_vm0, %v263_v35  ;;  %v264_v38 = vsel %vm241_vm6, %v233_v23, %v256_v34 }
  0x1b   : > { %273 = vst.msk [vmem:[%s414_s29 + $0x28] sm:$0xff] %vm267_vm0, %v264_v38  ;;  %vm242_vm7 = vcmp.ge.f32.partialorder %v234_v36, 0.0  ;;  %v257_v39 = vmul.f32 %v342_v11, %v234_v36  ;;  %vm243_vm8 = vcmp.ge.f32.partialorder %v235_v37, 0.0  ;;  %v258_v40 = vmul.f32 %v342_v11, %v235_v37 }
  0x1d   : > { %v265_v41 = vsel %vm242_vm7, %v234_v36, %v257_v39  ;;  %v266_v42 = vsel %vm243_vm8, %v235_v37, %v258_v40 }
  0x1e   : > { %274 = vst.msk [vmem:[%s414_s29 + $0x30] sm:$0xff] %vm267_vm0, %v265_v41  ;;  %275 = vst.msk [vmem:[%s414_s29 + $0x38] sm:$0xff] %vm267_vm0, %v266_v42 }
  0x1f PF: > { %s14_s15 = sadd.s32 1, %s361_s15  }
  0x20   : > { %p11_p4 = scmp.ge.s32.totalorder %s14_s15, 4  }
  0x22   :  { %13 = sbr.rel (!%p11_p4) target bundleno = 1 (0x1), region = 66 }

// kernel: down_forward.3
= control target key start
LH: loop header
LB: loop body
LE: loop exit
PB: predicated region body
PF: predicated region fallthrough
CT: control target
= control target key end

     0   :  { %s1195_s15 = smov 0   ;;  %s1518_s0 = inlined_call_operand.vmem [shape: f32[2,8,2,8,8], index: 0, kind: input, shape index: {}]   ;;  %s1519_s1 = inlined_call_operand.vmem [shape: f32[36,8], index: 1, kind: input, shape index: {}]   ;;  %s1520_s2 = inlined_call_operand.vmem [shape: f32[1,8], index: 2, kind: input, shape index: {}]   ;;  %s1521_s3 = inlined_call_operand.vmem [shape: f32[2,8,8,8], index: 3, kind: output, shape index: {0}]   ;;  %s1522_s4 = inlined_call_operand.vmem [shape: f32[2,2,8], index: 4, kind: output, shape index: {1}]  }
   0x1 LB: > { %s1061_s16 = sadd.s32 4294967295, %s1158_s15   ;;  %p1065_p0 = scmp.ge.s32.totalorder %s1158_s15, 1  ;;  %s1158_s15 = sphi %s1195_s15, %s15_s15  }
   0x2   : > { %p165_p1 = scmp.lt.s32.totalorder %s1158_s15, 3 }
   0x4   : > { %p166_p2 = pnand %p1065_p0, %p165_p1 }
   0x5   : > { %p1205_p3 = scmp.lt.s32.totalorder (!%p166_p2), %s1061_s16, 1  ;;  %vm313_vm0 = vcmask (!%p166_p2), 31744   ;;  %vm315_vm1 = vcmask (!%p166_p2), 25600   ;;  %vm320_vm2 = vcmask (!%p166_p2), 24576   ;;  %v1160_v0 = vmov (!%p166_p2), 0.0   ;;  %s1161_s22 = smov (!%p166_p2), 124  }
   0x6   : > { %169 = sbr.rel (%p166_p2) target bundleno = 631 (0x277), region = 32  ;;  %314 = vst.msk [vmem:[#allocation2] sm:$0xff] (!%p166_p2), %vm313_vm0, %v1160_v0  ;;  %318 = vst.msk [vmem:[#allocation2 + $0x90] sm:$0xff] (!%p166_p2), %vm313_vm0, %v1160_v0  ;;  %s1162_s23 = smov (!%p166_p2), 4   ;;  %vm406_vm3 = vcmask (!%p166_p2), 64544   ;;  %vm455_vm4 = vcmask (!%p166_p2), 97344  }
   0x7   : > { %316 = vst.msk [vmem:[#allocation2 + $0x8] sm:$0x3] (!%p166_p2), %vm315_vm1, %v1160_v0  ;;  %319 = vst.msk [vmem:[#allocation2 + $0x98] sm:$0x3] (!%p166_p2), %vm315_vm1, %v1160_v0  ;;  %s1163_s24 = smov (!%p166_p2), 8   ;;  %s1164_s25 = smov (!%p166_p2), 12  }
   0x8   : > { %322 = vst.msk [vmem:[#allocation2 + $0x10] sm:$0x1] (!%p166_p2), %vm320_vm2, %v1160_v0  ;;  %323 = vst.msk [vmem:[#allocation2 + $0x20] sm:$0x1] (!%p166_p2), %vm320_vm2, %v1160_v0  ;;  %s1165_s26 = smov (!%p166_p2), 16   ;;  %s1166_s27 = smov (!%p166_p2), 20  }
   0x9   : > { %324 = vst.msk [vmem:[#allocation2 + $0x30] sm:$0x1] (!%p166_p2), %vm320_vm2, %v1160_v0  ;;  %325 = vst.msk [vmem:[#allocation2 + $0x40] sm:$0x1] (!%p166_p2), %vm320_vm2, %v1160_v0  ;;  %s1167_s28 = smov (!%p166_p2), 24   ;;  %s1168_s7 = smov (!%p166_p2), 28  }
   0xa   : > { %326 = vst.msk [vmem:[#allocation2 + $0x50] sm:$0x1] (!%p166_p2), %vm320_vm2, %v1160_v0  ;;  %327 = vst.msk [vmem:[#allocation2 + $0x60] sm:$0x1] (!%p166_p2), %vm320_vm2, %v1160_v0  ;;  %vm804_vm5 = vcmask (!%p166_p2), 1043456   ;;  %s1169_s14 = smov (!%p166_p2), 32  }
   0xb   : > { %328 = vst.msk [vmem:[#allocation2 + $0x70] sm:$0x1] (!%p166_p2), %vm320_vm2, %v1160_v0  ;;  %329 = vst.msk [vmem:[#allocation2 + $0x80] sm:$0x1] (!%p166_p2), %vm320_vm2, %v1160_v0  ;;  %vm504_vm6 = vcmask (!%p166_p2), 130144   ;;  %vm553_vm7 = vcmask (!%p166_p2), 162944  }
   0xc   : > { %332 = vst.msk [vmem:[#allocation2 + $0x19] sm:$0x1] (!%p166_p2), %vm320_vm2, %v1160_v0  ;;  %333 = vst.msk [vmem:[#allocation2 + $0x29] sm:$0x1] (!%p166_p2), %vm320_vm2, %v1160_v0  ;;  %vm602_vm8 = vcmask (!%p166_p2), 195744   ;;  %vm652_vm9 = vcmask (!%p166_p2), 228544  }
   0xd   : > { %334 = vst.msk [vmem:[#allocation2 + $0x39] sm:$0x1] %vm320_vm2, %v1160_v0  ;;  %335 = vst.msk [vmem:[#allocation2 + $0x49] sm:$0x1] %vm320_vm2, %v1160_v0  ;;  %s1525_s16 = smov (!%p1205_p3, %s1061_s16), 1  ;;  %vm701_vm10 = vcmask 261344  }
   0xe   : > { %336 = vst.msk [vmem:[#allocation2 + $0x59] sm:$0x1] %vm320_vm2, %v1160_v0  ;;  %337 = vst.msk [vmem:[#allocation2 + $0x69] sm:$0x1] %vm320_vm2, %v1160_v0  ;;  %s1083_s18 = sshll.u32 %s1525_s16, 7  ;;  %v366_v17 = vld [vmem:[#allocation2 + $0x1] sm:$0xff] }
   0xf   : > { %338 = vst.msk [vmem:[#allocation2 + $0x79] sm:$0x1] %vm320_vm2, %v1160_v0  ;;  %339 = vst.msk [vmem:[#allocation2 + $0x89] sm:$0x1] %vm320_vm2, %v1160_v0  ;;  %s1241_s21 = scalar_lea.vmem %s1518_s0, %s1083_s18  ;;  %vm750_vm11 = vcmask 294144   ;;  %vm779_vm12 = vcmask 293888  }
  0x10   : > { %331 = vst.msk [vmem:[#allocation2 + $0x9] sm:$0x1] %vm320_vm2, %v1160_v0  ;;  %321 = vst.msk [vmem:[#allocation2] sm:$0x1] %vm320_vm2, %v1160_v0  ;;  %v209_v1 = vld [vmem:[%s1241_s21] sm:$0xff]  ;;  %v211_v2 = vld [vmem:[%s1241_s21 + $0x10] sm:$0xff] }
  0x11   : > { %330 = vst.msk [vmem:[#allocation2 + $0x90] sm:$0x1] %vm320_vm2, %v1160_v0  ;;  %340 = vst.msk [vmem:[#allocation2 + $0x99] sm:$0x1] %vm320_vm2, %v1160_v0  ;;  %241 = vrot.lane.b32.xlu0 %v209_v1, %s1161_s22  ;;  %245 = vrot.lane.b32.xlu1 %v211_v2, %s1161_s22  ;;  %v210_v3 = vld [vmem:[%s1241_s21 + $0x8] sm:$0xff]  ;;  %v212_v4 = vld [vmem:[%s1241_s21 + $0x18] sm:$0xff] }
  0x12   : > { %v214_v5 = vld [vmem:[%s1241_s21 + $0x28] sm:$0xff]  ;;  %v213_v6 = vld [vmem:[%s1241_s21 + $0x20] sm:$0xff]  ;;  %v216_v7 = vld [vmem:[%s1241_s21 + $0x38] sm:$0xff]  ;;  %s1084_s17 = sshll.u32 %s1525_s16, 6  ;;  %vm913_vm13 = vcmask 64512   ;;  %vm943_vm14 = vcmask 57344  }
  0x13   : > { %v215_v8 = vld [vmem:[%s1241_s21 + $0x30] sm:$0xff]  ;;  %v218_v9 = vld [vmem:[%s1241_s21 + $0x48] sm:$0xff]  ;;  %v217_v10 = vld [vmem:[%s1241_s21 + $0x40] sm:$0xff] }
  0x14   : > { %v1254_v11 = vld [vmem:[%s1241_s21 + $0x58] sm:$0xff]  ;;  %v1257_v12 = vld [vmem:[%s1241_s21 + $0x50] sm:$0xff]  ;;  %v1262_v13 = vld [vmem:[%s1241_s21 + $0x68] sm:$0xff] }
  0x15   : > { %243 = vrot.lane.b32.xlu0 %v210_v3, %s1161_s22  ;;  %247 = vrot.lane.b32.xlu1 %v212_v4, %s1161_s22  ;;  %v1265_v14 = vld [vmem:[%s1241_s21 + $0x60] sm:$0xff]  ;;  %v1270_v15 = vld [vmem:[%s1241_s21 + $0x78] sm:$0xff] }
  0x16   : > { %v1273_v16 = vld [vmem:[%s1241_s21 + $0x70] sm:$0xff] }
  0x17   : > { %v415_v18 = vld [vmem:[#allocation2 + $0x2] sm:$0xff] }
  0x18   : > { %v350_v19 = vld [vmem:[#allocation2] sm:$0xff] }
  0x19   : > { %251 = vrot.lane.b32.xlu1 %v214_v5, %s1161_s22  ;;  %249 = vrot.lane.b32.xlu0 %v213_v6, %s1161_s22  ;;  %358 = vst.msk [vmem:[#allocation3] sm:$0xff] %vm313_vm0, %v350_v19 }
  0x1d   : > { %255 = vrot.lane.b32.xlu1 %v216_v7, %s1161_s22  ;;  %253 = vrot.lane.b32.xlu0 %v215_v8, %s1161_s22 }
  0x21   : > { %259 = vrot.lane.b32.xlu1 %v218_v9, %s1161_s22  ;;  %257 = vrot.lane.b32.xlu0 %v217_v10, %s1161_s22 }
  0x25   : > { %263 = vrot.lane.b32.xlu1 %v1254_v11, %s1161_s22  ;;  %261 = vrot.lane.b32.xlu0 %v1257_v12, %s1161_s22 }
  0x29   : > { %267 = vrot.lane.b32.xlu1 %v1262_v13, %s1161_s22  ;;  %265 = vrot.lane.b32.xlu0 %v1265_v14, %s1161_s22 }
  0x2d   : > { %271 = vrot.lane.b32.xlu1 %v1270_v15, %s1161_s22  ;;  %269 = vrot.lane.b32.xlu0 %v1273_v16, %s1161_s22  ;;  %s1477_s22 = scalar_lea.vmem %s1521_s3, %s1084_s17 }
  0x31   : > { %382 = vrot.lane.b32.xlu0 %v366_v17, %s1162_s23 }
  0x35   : > { %431 = vrot.lane.b32.xlu0 %v415_v18, %s1163_s24  ;;  %v771_v18 = vld [vmem:[%s1519_s1 + $0x20] sm:$0xf] }
  0x83   : > { %v242_v20 = vpop.permute.xlu0 %241  ;;  %v246_v21 = vpop.permute.xlu1 %245 }
  0x84   : > { %v291_v22 = vmax.f32 %v211_v2, %v246_v21  ;;  %v289_v25 = vmax.f32 %v209_v1, %v242_v20 }
  0x87   : > { %v244_v23 = vpop.permute.xlu0 %243  ;;  %v248_v24 = vpop.permute.xlu1 %247 }
  0x88   : > { %v290_v26 = vmax.f32 %v210_v3, %v244_v23  ;;  %v292_v27 = vmax.f32 %v212_v4, %v248_v24 }
  0x8a   : > { %v305_v28 = vmax.f32 %v289_v25, %v290_v26  ;;  %v306_v29 = vmax.f32 %v291_v22, %v292_v27 }
  0x8b   : > { %v252_v30 = vpop.permute.xlu1 %251  ;;  %v250_v31 = vpop.permute.xlu0 %249 }
  0x8c   : > { %342 = vst.msk [vmem:[#allocation2 + $0x11] sm:$0xff] %vm313_vm0, %v305_v28  ;;  %343 = vst.msk [vmem:[#allocation2 + $0x21] sm:$0xff] %vm313_vm0, %v306_v29  ;;  %v294_v32 = vmax.f32 %v214_v5, %v252_v30  ;;  %v293_v33 = vmax.f32 %v213_v6, %v250_v31  ;;  %v619_v29 = vld [vmem:[#allocation2 + $0x90] sm:$0xff] }
  0x8e   : > { %v307_v34 = vmax.f32 %v293_v33, %v294_v32  ;;  %v668_v32 = vld [vmem:[#allocation2 + $0x91] sm:$0xff] }
  0x8f   : > { %v256_v35 = vpop.permute.xlu1 %255  ;;  %v254_v36 = vpop.permute.xlu0 %253 }
  0x90   : > { %344 = vst.msk [vmem:[#allocation2 + $0x31] sm:$0xff] %vm313_vm0, %v307_v34  ;;  %v296_v37 = vmax.f32 %v216_v7, %v256_v35  ;;  %v295_v38 = vmax.f32 %v215_v8, %v254_v36  ;;  %v717_v35 = vld [vmem:[#allocation2 + $0x92] sm:$0xff] }
  0x92   : > { %v308_v39 = vmax.f32 %v295_v38, %v296_v37 }
  0x93   : > { %v464_v40 = vld [vmem:[#allocation2 + $0x10] sm:$0xff]  ;;  %v260_v42 = vpop.permute.xlu1 %259  ;;  %v258_v43 = vpop.permute.xlu0 %257  ;;  %v465_v44 = vld [vmem:[#allocation2 + $0x20] sm:$0xff] }
  0x94   : > { %v367_v41 = vld [vmem:[#allocation2 + $0x11] sm:$0xff]  ;;  %480 = vrot.lane.b32.xlu0 %v464_v40, %s1164_s25  ;;  %345 = vst.msk [vmem:[#allocation2 + $0x41] sm:$0xff] %vm313_vm0, %v308_v39  ;;  %v298_v45 = vmax.f32 %v218_v9, %v260_v42  ;;  %v297_v46 = vmax.f32 %v217_v10, %v258_v43  ;;  %359 = vst.msk [vmem:[#allocation3 + $0x8] sm:$0xff] %vm313_vm0, %v464_v40  ;;  %v514_v55 = vld [vmem:[#allocation2 + $0x21] sm:$0xff] }
  0x95   : > { %384 = vrot.lane.b32.xlu1 %v367_v41, %s1162_s23  ;;  %360 = vst.msk [vmem:[#allocation3 + $0x10] sm:$0xff] %vm313_vm0, %v465_v44  ;;  %v416_v48 = vld [vmem:[#allocation2 + $0x12] sm:$0xff]  ;;  %v563_v5 = vld [vmem:[#allocation2 + $0x22] sm:$0xff] }
  0x96   : > { %v309_v47 = vmax.f32 %v297_v46, %v298_v45 }
  0x97   : > { %v613_v49 = vld [vmem:[#allocation2 + $0x30] sm:$0xff]  ;;  %v264_v50 = vpop.permute.xlu1 %263  ;;  %v262_v51 = vpop.permute.xlu0 %261 }
  0x98   : > { %529 = vrot.lane.b32.xlu0 %v367_v41, %s1165_s26  ;;  %346 = vst.msk [vmem:[#allocation2 + $0x51] sm:$0xff] %vm313_vm0, %v309_v47  ;;  %v300_v52 = vmax.f32 %v1254_v11, %v264_v50  ;;  %v299_v53 = vmax.f32 %v1257_v12, %v262_v51  ;;  %361 = vst.msk [vmem:[#allocation3 + $0x18] sm:$0xff] %vm313_vm0, %v613_v49  ;;  %v369_v61 = vld [vmem:[#allocation2 + $0x31] sm:$0xff]  ;;  %v767_v11 = vld [vmem:[%s1519_s1] sm:$0xff] }
  0x99   : > { %433 = vrot.lane.b32.xlu1 %v416_v48, %s1163_s24  ;;  %v418_v8 = vld [vmem:[#allocation2 + $0x32] sm:$0xff]  ;;  %v768_v12 = vld [vmem:[%s1519_s1 + $0x8] sm:$0xff] }
  0x9a   : > { %v310_v54 = vmax.f32 %v299_v53, %v300_v52 }
  0x9b   : > { %v1294_v56 = vld [vmem:[#allocation2 + $0x40] sm:$0xff]  ;;  %v268_v57 = vpop.permute.xlu1 %267  ;;  %v266_v58 = vpop.permute.xlu0 %265 }
  0x9c   : > { %531 = vrot.lane.b32.xlu0 %v514_v55, %s1165_s26  ;;  %347 = vst.msk [vmem:[#allocation2 + $0x61] sm:$0xff] %vm313_vm0, %v310_v54  ;;  %v302_v59 = vmax.f32 %v1262_v13, %v268_v57  ;;  %v301_v60 = vmax.f32 %v1265_v14, %v266_v58  ;;  %362 = vst.msk [vmem:[#allocation3 + $0x20] sm:$0xff] %vm313_vm0, %v1294_v56  ;;  %v1120_v13 = vpack.c.bf16 %v768_v12, %v767_v11  ;;  %v370_v14 = vld [vmem:[#allocation2 + $0x41] sm:$0xff] }
  0x9d   : > { %482 = vrot.lane.b32.xlu1 %v465_v44, %s1164_s25  ;;  %v565_v20 = vld [vmem:[#allocation2 + $0x42] sm:$0xff] }
  0x9e   : > { %v311_v62 = vmax.f32 %v301_v60, %v302_v59  ;;  %1121 = vmatprep.subr.bf16.mxu0 %v1120_v13  ;;  %1128 = vmatprep.subr.bf16.mxu1 %v1120_v13 }
  0x9f   : > { %v1303_v63 = vld [vmem:[#allocation2 + $0x50] sm:$0xff]  ;;  %v272_v0 = vpop.permute.xlu1 %271  ;;  %v270_v1 = vpop.permute.xlu0 %269  ;;  %1123 = vmatpush3.bf16.msra.mxu0 %v1120_v13  ;;  %1131 = vmatpush3.bf16.msra.mxu1 %v1120_v13 }
  0xa0   : > { %388 = vrot.lane.b32.xlu0 %v369_v61, %s1162_s23  ;;  %348 = vst.msk [vmem:[#allocation2 + $0x71] sm:$0xff] %vm313_vm0, %v311_v62  ;;  %v304_v2 = vmax.f32 %v1270_v15, %v272_v0  ;;  %v303_v3 = vmax.f32 %v1273_v16, %v270_v1  ;;  %363 = vst.msk [vmem:[#allocation3 + $0x28] sm:$0xff] %vm313_vm0, %v1303_v63  ;;  %v769_v15 = vld [vmem:[%s1519_s1 + $0x10] sm:$0xff]  ;;  %v770_v16 = vld [vmem:[%s1519_s1 + $0x18] sm:$0xff] }
  0xa1   : > { %386 = vrot.lane.b32.xlu1 %v514_v55, %s1162_s23  ;;  %v1124_v17 = vpack.c.bf16 %v770_v16, %v769_v15  ;;  %v371_v19 = vld [vmem:[#allocation2 + $0x51] sm:$0xff] }
  0xa2   : > { %v312_v4 = vmax.f32 %v303_v3, %v304_v2  ;;  %v420_v21 = vld [vmem:[#allocation2 + $0x52] sm:$0xff] }
  0xa3   : > { %v1312_v6 = vld [vmem:[#allocation2 + $0x60] sm:$0xff]  ;;  %v383_v7 = vpop.permute.xlu0 %382  ;;  %1125 = vmatprep.subr.bf16.mxu0 %v1124_v17  ;;  %1129 = vmatprep.subr.bf16.mxu1 %v1124_v17 }
  0xa4   : > { %580 = vrot.lane.b32.xlu0 %v563_v5, %s1166_s27  ;;  %349 = vst.msk [vmem:[#allocation2 + $0x81] sm:$0xff] %vm313_vm0, %v312_v4  ;;  %364 = vst.msk [vmem:[#allocation3 + $0x30] sm:$0xff] %vm313_vm0, %v1312_v6  ;;  %1127 = vmatpush3.bf16.msra.mxu0 %v1124_v17  ;;  %v372_v22 = vld [vmem:[#allocation2 + $0x61] sm:$0xff] }
  0xa5   : > { %578 = vrot.lane.b32.xlu1 %v416_v48, %s1166_s27  ;;  %407 = vst.msk [vmem:[#allocation3] sm:$0xff] %vm406_vm3, %v383_v7  ;;  %1132 = vmatpush3.bf16.msra.mxu1 %v1124_v17  ;;  %v567_v24 = vld [vmem:[#allocation2 + $0x62] sm:$0xff] }
  0xa6   : > { %1106 = vmatprep.subr.msk.mxu0 %vm804_vm5, %v771_v18  ;;  %1130 = vmatprep.subr.msk.mxu1 %vm804_vm5, %v771_v18 }
  0xa7   : > { %v1320_v9 = vld [vmem:[#allocation2 + $0x70] sm:$0xff]  ;;  %v432_v10 = vpop.permute.xlu0 %431 }
  0xa8   : > { %437 = vrot.lane.b32.xlu0 %v418_v8, %s1163_s24  ;;  %456 = vst.msk [vmem:[#allocation3] sm:$0xff] %vm455_vm4, %v432_v10  ;;  %1107 = vmatpush3.msk.msra.mxu0 %vm804_vm5, %v771_v18  ;;  %v373_v23 = vld [vmem:[#allocation2 + $0x71] sm:$0xff] }
  0xa9   : > { %435 = vrot.lane.b32.xlu1 %v563_v5, %s1163_s24  ;;  %365 = vst.msk [vmem:[#allocation3 + $0x38] sm:$0xff] %vm313_vm0, %v1320_v9  ;;  %1133 = vmatpush3.msk.msra.mxu1 %vm804_vm5, %v771_v18  ;;  %v422_v25 = vld [vmem:[#allocation2 + $0x72] sm:$0xff] }
  0xab   : > { %v471_v26 = vld [vmem:[#allocation2 + $0x80] sm:$0xff] }
  0xac   : > { %630 = vrot.lane.b32.xlu0 %v613_v49, %s1167_s28  ;;  %v520_v27 = vld [vmem:[#allocation2 + $0x81] sm:$0xff] }
  0xad   : > { %628 = vrot.lane.b32.xlu1 %v465_v44, %s1167_s28  ;;  %v569_v28 = vld [vmem:[#allocation2 + $0x82] sm:$0xff] }
  0xb0   : > { %486 = vrot.lane.b32.xlu0 %v1294_v56, %s1164_s25 }
  0xb1   : > { %484 = vrot.lane.b32.xlu1 %v613_v49, %s1164_s25 }
  0xb4   : > { %679 = vrot.lane.b32.xlu0 %v369_v61, %s1168_s7 }
  0xb5   : > { %677 = vrot.lane.b32.xlu1 %v514_v55, %s1168_s7 }
  0xb8   : > { %390 = vrot.lane.b32.xlu0 %v370_v14, %s1162_s23 }
  0xb9   : > { %533 = vrot.lane.b32.xlu1 %v369_v61, %s1165_s26 }
  0xbc   : > { %582 = vrot.lane.b32.xlu0 %v418_v8, %s1166_s27 }
  0xbd   : > { %726 = vrot.lane.b32.xlu1 %v563_v5, %s1169_s14 }
  0xc0   : > { %392 = vrot.lane.b32.xlu0 %v371_v19, %s1162_s23 }
  0xc1   : > { %535 = vrot.lane.b32.xlu1 %v370_v14, %s1165_s26 }
  0xc4   : > { %584 = vrot.lane.b32.xlu0 %v565_v20, %s1166_s27 }
  0xc5   : > { %728 = vrot.lane.b32.xlu1 %v418_v8, %s1169_s14 }
  0xc8   : > { %441 = vrot.lane.b32.xlu0 %v420_v21, %s1163_s24 }
  0xc9   : > { %439 = vrot.lane.b32.xlu1 %v565_v20, %s1163_s24 }
  0xcc   : > { %634 = vrot.lane.b32.xlu0 %v1303_v63, %s1167_s28 }
  0xcd   : > { %632 = vrot.lane.b32.xlu1 %v1294_v56, %s1167_s28 }
  0xd0   : > { %490 = vrot.lane.b32.xlu0 %v1312_v6, %s1164_s25 }
  0xd1   : > { %488 = vrot.lane.b32.xlu1 %v1303_v63, %s1164_s25 }
  0xd4   : > { %683 = vrot.lane.b32.xlu0 %v371_v19, %s1168_s7 }
  0xd5   : > { %681 = vrot.lane.b32.xlu1 %v370_v14, %s1168_s7 }
  0xd8   : > { %394 = vrot.lane.b32.xlu0 %v372_v22, %s1162_s23 }
  0xd9   : > { %537 = vrot.lane.b32.xlu1 %v371_v19, %s1165_s26 }
  0xdc   : > { %586 = vrot.lane.b32.xlu0 %v420_v21, %s1166_s27 }
  0xdd   : > { %730 = vrot.lane.b32.xlu1 %v565_v20, %s1169_s14 }
  0xe0   : > { %396 = vrot.lane.b32.xlu0 %v373_v23, %s1162_s23  ;;  %s1070_s23 = sshll.u32 %s1525_s16, 1 }
  0xe1   : > { %539 = vrot.lane.b32.xlu1 %v372_v22, %s1165_s26 }
  0xe4   : > { %588 = vrot.lane.b32.xlu0 %v567_v24, %s1166_s27 }
  0xe5   : > { %732 = vrot.lane.b32.xlu1 %v420_v21, %s1169_s14 }
  0xe8   : > { %445 = vrot.lane.b32.xlu0 %v422_v25, %s1163_s24 }
  0xe9   : > { %443 = vrot.lane.b32.xlu1 %v567_v24, %s1163_s24 }
  0xec   : > { %638 = vrot.lane.b32.xlu0 %v1320_v9, %s1167_s28 }
  0xed   : > { %636 = vrot.lane.b32.xlu1 %v1312_v6, %s1167_s28 }
  0xf0   : > { %494 = vrot.lane.b32.xlu0 %v471_v26, %s1164_s25 }
  0xf1   : > { %492 = vrot.lane.b32.xlu1 %v1320_v9, %s1164_s25 }
  0xf4   : > { %687 = vrot.lane.b32.xlu0 %v373_v23, %s1168_s7 }
  0xf5   : > { %685 = vrot.lane.b32.xlu1 %v372_v22, %s1168_s7 }
  0xf8   : > { %543 = vrot.lane.b32.xlu0 %v520_v27, %s1165_s26 }
  0xf9   : > { %541 = vrot.lane.b32.xlu1 %v373_v23, %s1165_s26  ;;  %s208_s26 = scalar_lea.vmem %s1522_s4, %s1070_s23 }
  0xfc   : > { %736 = vrot.lane.b32.xlu0 %v422_v25, %s1169_s14 }
  0xfd   : > { %734 = vrot.lane.b32.xlu1 %v567_v24, %s1169_s14 }
 0x100   : > { %640 = vrot.lane.b32.xlu0 %v471_v26, %s1167_s28 }
 0x101   : > { %590 = vrot.lane.b32.xlu1 %v422_v25, %s1166_s27 }
 0x104   : > { %689 = vrot.lane.b32.xlu0 %v520_v27, %s1168_s7 }
 0x105   : > { %592 = vrot.lane.b32.xlu1 %v569_v28, %s1166_s27 }
 0x106   : > { %v481_v31 = vpop.permute.xlu0 %480 }
 0x107   : > { %v385_v30 = vpop.permute.xlu1 %384  ;;  %505 = vst.msk [vmem:[#allocation3] sm:$0xff] %vm504_vm6, %v481_v31 }
 0x108   : > { %408 = vst.msk [vmem:[#allocation3 + $0x8] sm:$0xff] %vm406_vm3, %v385_v30  ;;  %738 = vrot.lane.b32.xlu0 %v569_v28, %s1169_s14 }
 0x109   : > { %642 = vrot.lane.b32.xlu1 %v619_v29, %s1167_s28 }
 0x10a   : > { %v530_v34 = vpop.permute.xlu0 %529 }
 0x10b   : > { %v434_v33 = vpop.permute.xlu1 %433  ;;  %554 = vst.msk [vmem:[#allocation3] sm:$0xff] %vm553_vm7, %v530_v34 }
 0x10c   : > { %457 = vst.msk [vmem:[#allocation3 + $0x8] sm:$0xff] %vm455_vm4, %v434_v33 }
 0x10d   : > { %691 = vrot.lane.b32.xlu1 %v668_v32, %s1168_s7 }
 0x10e   : > { %v532_v37 = vpop.permute.xlu0 %531 }
 0x10f   : > { %v483_v36 = vpop.permute.xlu1 %482 }
 0x110   : > { %506 = vst.msk [vmem:[#allocation3 + $0x8] sm:$0xff] %vm504_vm6, %v483_v36 }
 0x111   : > { %555 = vst.msk [vmem:[#allocation3 + $0x8] sm:$0xff] %vm553_vm7, %v532_v37  ;;  %740 = vrot.lane.b32.xlu1 %v717_v35, %s1169_s14 }
 0x112   : > { %v389_v39 = vpop.permute.xlu0 %388 }
 0x113   : > { %v387_v38 = vpop.permute.xlu1 %386  ;;  %410 = vst.msk [vmem:[#allocation3 + $0x18] sm:$0xff] %vm406_vm3, %v389_v39 }
 0x114   : > { %409 = vst.msk [vmem:[#allocation3 + $0x10] sm:$0xff] %vm406_vm3, %v387_v38  ;;  %v1071_v38 = vld [vmem:[%s1520_s2] ss:$0 sm:$0xff] }
 0x116   : > { %v581_v41 = vpop.permute.xlu0 %580 }
 0x117   : > { %v579_v40 = vpop.permute.xlu1 %578  ;;  %604 = vst.msk [vmem:[#allocation3 + $0x8] sm:$0xff] %vm602_vm8, %v581_v41 }
 0x118   : > { %603 = vst.msk [vmem:[#allocation3] sm:$0xff] %vm602_vm8, %v579_v40 }
 0x11a   : > { %v438_v43 = vpop.permute.xlu0 %437 }
 0x11b   : > { %v436_v42 = vpop.permute.xlu1 %435  ;;  %459 = vst.msk [vmem:[#allocation3 + $0x18] sm:$0xff] %vm455_vm4, %v438_v43 }
 0x11c   : > { %458 = vst.msk [vmem:[#allocation3 + $0x10] sm:$0xff] %vm455_vm4, %v436_v42 }
 0x11e   : > { %v631_v45 = vpop.permute.xlu0 %630 }
 0x11f   : > { %v629_v44 = vpop.permute.xlu1 %628  ;;  %654 = vst.msk [vmem:[#allocation3 + $0x8] sm:$0xff] %vm652_vm9, %v631_v45 }
 0x120   : > { %653 = vst.msk [vmem:[#allocation3] sm:$0xff] %vm652_vm9, %v629_v44 }
 0x122   : > { %v487_v47 = vpop.permute.xlu0 %486 }
 0x123   : > { %v485_v46 = vpop.permute.xlu1 %484  ;;  %508 = vst.msk [vmem:[#allocation3 + $0x18] sm:$0xff] %vm504_vm6, %v487_v47 }
 0x124   : > { %507 = vst.msk [vmem:[#allocation3 + $0x10] sm:$0xff] %vm504_vm6, %v485_v46 }
 0x126   : > { %v680_v49 = vpop.permute.xlu0 %679 }
 0x127   : > { %v678_v48 = vpop.permute.xlu1 %677  ;;  %703 = vst.msk [vmem:[#allocation3 + $0x8] sm:$0xff] %vm701_vm10, %v680_v49 }
 0x128   : > { %702 = vst.msk [vmem:[#allocation3] sm:$0xff] %vm701_vm10, %v678_v48 }
 0x12a   : > { %v391_v51 = vpop.permute.xlu0 %390 }
 0x12b   : > { %v534_v50 = vpop.permute.xlu1 %533  ;;  %411 = vst.msk [vmem:[#allocation3 + $0x20] sm:$0xff] %vm406_vm3, %v391_v51 }
 0x12c   : > { %556 = vst.msk [vmem:[#allocation3 + $0x10] sm:$0xff] %vm553_vm7, %v534_v50 }
 0x12e   : > { %v583_v53 = vpop.permute.xlu0 %582 }
 0x12f   : > { %v727_v52 = vpop.permute.xlu1 %726  ;;  %605 = vst.msk [vmem:[#allocation3 + $0x10] sm:$0xff] %vm602_vm8, %v583_v53 }
 0x130   : > { %751 = vst.msk [vmem:[#allocation3] sm:$0xff] %vm750_vm11, %v727_v52 }
 0x132   : > { %v393_v55 = vpop.permute.xlu0 %392 }
 0x133   : > { %v536_v54 = vpop.permute.xlu1 %535  ;;  %412 = vst.msk [vmem:[#allocation3 + $0x28] sm:$0xff] %vm406_vm3, %v393_v55 }
 0x134   : > { %557 = vst.msk [vmem:[#allocation3 + $0x18] sm:$0xff] %vm553_vm7, %v536_v54 }
 0x136   : > { %v585_v57 = vpop.permute.xlu0 %584 }
 0x137   : > { %v729_v56 = vpop.permute.xlu1 %728  ;;  %v759_v58 = vld [vmem:[#allocation3] sm:$0xff]  ;;  %606 = vst.msk [vmem:[#allocation3 + $0x18] sm:$0xff] %vm602_vm8, %v585_v57 }
 0x138   : > { %752 = vst.msk [vmem:[#allocation3 + $0x8] sm:$0xff] %vm750_vm11, %v729_v56  ;;  %1108 = vmatprep.mubr.msk.f32.mxu0 %vm779_vm12, %v759_v58 }
 0x13a   : > { %v442_v60 = vpop.permute.xlu0 %441 }
 0x13b   : > { %v440_v59 = vpop.permute.xlu1 %439  ;;  %461 = vst.msk [vmem:[#allocation3 + $0x28] sm:$0xff] %vm455_vm4, %v442_v60 }
 0x13c   : > { %460 = vst.msk [vmem:[#allocation3 + $0x20] sm:$0xff] %vm455_vm4, %v440_v59 }
 0x13e   : > { %v635_v62 = vpop.permute.xlu0 %634 }
 0x13f   : > { %v633_v61 = vpop.permute.xlu1 %632  ;;  %v760_v63 = vld [vmem:[#allocation3 + $0x8] sm:$0xff]  ;;  %656 = vst.msk [vmem:[#allocation3 + $0x18] sm:$0xff] %vm652_vm9, %v635_v62 }
 0x140   : > { %655 = vst.msk [vmem:[#allocation3 + $0x10] sm:$0xff] %vm652_vm9, %v633_v61  ;;  %1109 = vmatmul.mubr.msk.f32.vlgmr.msra.gmra.mrb[0].mxu0 %vm779_vm12, %v760_v63 }
 0x142   : > { %v491_v1 = vpop.permute.xlu0 %490 }
 0x143   : > { %v489_v0 = vpop.permute.xlu1 %488  ;;  %510 = vst.msk [vmem:[#allocation3 + $0x28] sm:$0xff] %vm504_vm6, %v491_v1 }
 0x144   : > { %509 = vst.msk [vmem:[#allocation3 + $0x20] sm:$0xff] %vm504_vm6, %v489_v0 }
 0x146   : > { %v684_v3 = vpop.permute.xlu0 %683 }
 0x147   : > { %v682_v2 = vpop.permute.xlu1 %681  ;;  %705 = vst.msk [vmem:[#allocation3 + $0x18] sm:$0xff] %vm701_vm10, %v684_v3 }
 0x148   : > { %704 = vst.msk [vmem:[#allocation3 + $0x10] sm:$0xff] %vm701_vm10, %v682_v2 }
 0x14a   : > { %v395_v5 = vpop.permute.xlu0 %394 }
 0x14b   : > { %v538_v4 = vpop.permute.xlu1 %537  ;;  %413 = vst.msk [vmem:[#allocation3 + $0x30] sm:$0xff] %vm406_vm3, %v395_v5 }
 0x14c   : > { %558 = vst.msk [vmem:[#allocation3 + $0x20] sm:$0xff] %vm553_vm7, %v538_v4 }
 0x14e   : > { %v587_v7 = vpop.permute.xlu0 %586 }
 0x14f   : > { %v731_v6 = vpop.permute.xlu1 %730  ;;  %607 = vst.msk [vmem:[#allocation3 + $0x20] sm:$0xff] %vm602_vm8, %v587_v7 }
 0x150   : > { %753 = vst.msk [vmem:[#allocation3 + $0x10] sm:$0xff] %vm750_vm11, %v731_v6 }
 0x152   : > { %v397_v9 = vpop.permute.xlu0 %396 }
 0x153   : > { %v540_v8 = vpop.permute.xlu1 %539  ;;  %414 = vst.msk [vmem:[#allocation3 + $0x38] sm:$0xff] %vm406_vm3, %v397_v9 }
 0x154   : > { %559 = vst.msk [vmem:[#allocation3 + $0x28] sm:$0xff] %vm553_vm7, %v540_v8 }
 0x156   : > { %v589_v11 = vpop.permute.xlu0 %588 }
 0x157   : > { %v733_v10 = vpop.permute.xlu1 %732  ;;  %v761_v12 = vld [vmem:[#allocation3 + $0x10] sm:$0xff]  ;;  %608 = vst.msk [vmem:[#allocation3 + $0x28] sm:$0xff] %vm602_vm8, %v589_v11 }
 0x158   : > { %754 = vst.msk [vmem:[#allocation3 + $0x18] sm:$0xff] %vm750_vm11, %v733_v10  ;;  %1111 = vmatprep.mubr.msk.f32.mxu0 %vm779_vm12, %v761_v12 }
 0x15a   : > { %v446_v14 = vpop.permute.xlu0 %445 }
 0x15b   : > { %v444_v13 = vpop.permute.xlu1 %443  ;;  %463 = vst.msk [vmem:[#allocation3 + $0x38] sm:$0xff] %vm455_vm4, %v446_v14 }
 0x15c   : > { %462 = vst.msk [vmem:[#allocation3 + $0x30] sm:$0xff] %vm455_vm4, %v444_v13 }
 0x15e   : > { %v639_v16 = vpop.permute.xlu0 %638 }
 0x15f   : > { %v637_v15 = vpop.permute.xlu1 %636  ;;  %v762_v17 = vld [vmem:[#allocation3 + $0x18] sm:$0xff]  ;;  %658 = vst.msk [vmem:[#allocation3 + $0x28] sm:$0xff] %vm652_vm9, %v639_v16 }
 0x160   : > { %657 = vst.msk [vmem:[#allocation3 + $0x20] sm:$0xff] %vm652_vm9, %v637_v15  ;;  %1112 = vmatmul.mubr.msk.f32.gmra.mrb[2].mxu0 %vm779_vm12, %v762_v17 }
 0x162   : > { %v495_v19 = vpop.permute.xlu0 %494 }
 0x163   : > { %v493_v18 = vpop.permute.xlu1 %492  ;;  %512 = vst.msk [vmem:[#allocation3 + $0x38] sm:$0xff] %vm504_vm6, %v495_v19 }
 0x164   : > { %511 = vst.msk [vmem:[#allocation3 + $0x30] sm:$0xff] %vm504_vm6, %v493_v18 }
 0x166   : > { %v688_v21 = vpop.permute.xlu0 %687 }
 0x167   : > { %v686_v20 = vpop.permute.xlu1 %685  ;;  %707 = vst.msk [vmem:[#allocation3 + $0x28] sm:$0xff] %vm701_vm10, %v688_v21 }
 0x168   : > { %706 = vst.msk [vmem:[#allocation3 + $0x20] sm:$0xff] %vm701_vm10, %v686_v20 }
 0x16a   : > { %v544_v23 = vpop.permute.xlu0 %543 }
 0x16b   : > { %v542_v22 = vpop.permute.xlu1 %541  ;;  %561 = vst.msk [vmem:[#allocation3 + $0x38] sm:$0xff] %vm553_vm7, %v544_v23 }
 0x16c   : > { %560 = vst.msk [vmem:[#allocation3 + $0x30] sm:$0xff] %vm553_vm7, %v542_v22 }
 0x16e   : > { %v737_v25 = vpop.permute.xlu0 %736 }
 0x16f   : > { %v735_v24 = vpop.permute.xlu1 %734  ;;  %756 = vst.msk [vmem:[#allocation3 + $0x28] sm:$0xff] %vm750_vm11, %v737_v25 }
 0x170   : > { %755 = vst.msk [vmem:[#allocation3 + $0x20] sm:$0xff] %vm750_vm11, %v735_v24 }
 0x172   : > { %v641_v27 = vpop.permute.xlu0 %640 }
 0x173   : > { %v591_v26 = vpop.permute.xlu1 %590 }
 0x174   : > { %609 = vst.msk [vmem:[#allocation3 + $0x30] sm:$0xff] %vm602_vm8, %v591_v26 }
 0x175   : > { %659 = vst.msk [vmem:[#allocation3 + $0x30] sm:$0xff] %vm652_vm9, %v641_v27 }
 0x176   : > { %v690_v29 = vpop.permute.xlu0 %689  ;;  %v764_v31 = vld [vmem:[#allocation3 + $0x28] sm:$0xff] }
 0x177   : > { %v593_v28 = vpop.permute.xlu1 %592  ;;  %v763_v30 = vld [vmem:[#allocation3 + $0x20] sm:$0xff]  ;;  %708 = vst.msk [vmem:[#allocation3 + $0x30] sm:$0xff] %vm701_vm10, %v690_v29 }
 0x178   : > { %610 = vst.msk [vmem:[#allocation3 + $0x38] sm:$0xff] %vm602_vm8, %v593_v28  ;;  %1114 = vmatprep.mubr.msk.f32.mxu1 %vm779_vm12, %v763_v30 }
 0x179   : > { %1115 = vmatmul.mubr.msk.f32.vlgmr.msra.gmra.mrb[0].mxu1 %vm779_vm12, %v764_v31 }
 0x17a   : > { %v739_v33 = vpop.permute.xlu0 %738 }
 0x17b   : > { %v643_v32 = vpop.permute.xlu1 %642  ;;  %757 = vst.msk [vmem:[#allocation3 + $0x30] sm:$0xff] %vm750_vm11, %v739_v33 }
 0x17c   : > { %660 = vst.msk [vmem:[#allocation3 + $0x38] sm:$0xff] %vm652_vm9, %v643_v32 }
 0x17f   : > { %v692_v34 = vpop.permute.xlu1 %691 }
 0x180   : > { %709 = vst.msk [vmem:[#allocation3 + $0x38] sm:$0xff] %vm701_vm10, %v692_v34 }
 0x182   : > { %v765_v36 = vld [vmem:[#allocation3 + $0x30] sm:$0xff] }
 0x183   : > { %v741_v35 = vpop.permute.xlu1 %740  ;;  %1117 = vmatprep.mubr.msk.f32.mxu1 %vm779_vm12, %v765_v36 }
 0x184   : > { %758 = vst.msk [vmem:[#allocation3 + $0x38] sm:$0xff] %vm750_vm11, %v741_v35 }
 0x18b   : > { %v766_v37 = vld [vmem:[#allocation3 + $0x38] sm:$0xff] }
 0x18c   : > { %1118 = vmatmul.mubr.msk.f32.gmra.mrb[2].mxu1 %vm779_vm12, %v766_v37 }
 0x213   : > { %v1110_v39 = vpop.f32.mrb[0].mxu0 }
 0x214   : > { %v880_v40 = vadd.f32 %v1110_v39, %v1071_v38  ;;  %v874_v41 = vpop.f32.mrb[1].mxu0 }
 0x215   : > { %v875_v42 = vadd.f32 %v1071_v38, %v874_v41 }
 0x216   : > { %915 = vst.msk [vmem:[%s1477_s22 + $0x8] sm:$0xff] %vm913_vm13, %v880_v40  ;;  %v923_v43 = vsel %vm913_vm13, %v880_v40, 0.0  ;;  %v946_v44 = vmul.f32 %v880_v40, %v880_v40 }
 0x217   : > { %914 = vst.msk [vmem:[%s1477_s22] sm:$0xff] %vm913_vm13, %v875_v42  ;;  %v922_v45 = vsel %vm913_vm13, %v875_v42, 0.0  ;;  %v945_v46 = vmul.f32 %v875_v42, %v875_v42 }
 0x218   : > { %v954_v47 = vsel %vm913_vm13, %v946_v44, 0.0  ;;  %v924_v48 = vadd.f32 %v923_v43, %v922_v45 }
 0x219   : > { %v953_v49 = vsel %vm913_vm13, %v945_v46, 0.0 }
 0x21a   : > { %v955_v50 = vadd.f32 %v954_v47, %v953_v49 }
 0x233   : > { %v1113_v51 = vpop.f32.mrb[2].mxu0 }
 0x234   : > { %v890_v52 = vadd.f32 %v1113_v51, %v1071_v38  ;;  %v884_v53 = vpop.f32.mrb[3].mxu0 }
 0x235   : > { %v885_v54 = vadd.f32 %v1071_v38, %v884_v53 }
 0x236   : > { %917 = vst.msk [vmem:[%s1477_s22 + $0x18] sm:$0xff] %vm913_vm13, %v890_v52  ;;  %v948_v55 = vmul.f32 %v890_v52, %v890_v52  ;;  %v927_v59 = vsel %vm913_vm13, %v890_v52, 0.0 }
 0x237   : > { %916 = vst.msk [vmem:[%s1477_s22 + $0x10] sm:$0xff] %vm913_vm13, %v885_v54  ;;  %v925_v56 = vsel %vm913_vm13, %v885_v54, 0.0  ;;  %v947_v57 = vmul.f32 %v885_v54, %v885_v54 }
 0x238   : > { %v926_v58 = vadd.f32 %v925_v56, %v924_v48  ;;  %v958_v63 = vsel %vm913_vm13, %v948_v55, 0.0 }
 0x239   : > { %v956_v60 = vsel %vm913_vm13, %v947_v57, 0.0 }
 0x23a   : > { %v957_v61 = vadd.f32 %v956_v60, %v955_v50  ;;  %v928_v62 = vadd.f32 %v927_v59, %v926_v58 }
 0x23c   : > { %v959_v0 = vadd.f32 %v958_v63, %v957_v61 }
 0x24c   : > { %v1116_v1 = vpop.f32.mrb[0].mxu1 }
 0x24d   : > { %v900_v2 = vadd.f32 %v1116_v1, %v1071_v38  ;;  %v894_v3 = vpop.f32.mrb[1].mxu1 }
 0x24e   : > { %v895_v4 = vadd.f32 %v1071_v38, %v894_v3 }
 0x24f   : > { %919 = vst.msk [vmem:[%s1477_s22 + $0x28] sm:$0xff] %vm913_vm13, %v900_v2  ;;  %v950_v5 = vmul.f32 %v900_v2, %v900_v2  ;;  %v931_v9 = vsel %vm913_vm13, %v900_v2, 0.0 }
 0x250   : > { %918 = vst.msk [vmem:[%s1477_s22 + $0x20] sm:$0xff] %vm913_vm13, %v895_v4  ;;  %v929_v6 = vsel %vm913_vm13, %v895_v4, 0.0  ;;  %v949_v7 = vmul.f32 %v895_v4, %v895_v4 }
 0x251   : > { %v930_v8 = vadd.f32 %v929_v6, %v928_v62  ;;  %v962_v13 = vsel %vm913_vm13, %v950_v5, 0.0 }
 0x252   : > { %v960_v10 = vsel %vm913_vm13, %v949_v7, 0.0 }
 0x253   : > { %v961_v11 = vadd.f32 %v960_v10, %v959_v0  ;;  %v932_v12 = vadd.f32 %v931_v9, %v930_v8 }
 0x255   : > { %v963_v14 = vadd.f32 %v962_v13, %v961_v11 }
 0x25f   : > { %v1119_v15 = vpop.f32.mrb[2].mxu1 }
 0x260   : > { %v910_v16 = vadd.f32 %v1119_v15, %v1071_v38  ;;  %v904_v17 = vpop.f32.mrb[3].mxu1 }
 0x261   : > { %v905_v18 = vadd.f32 %v1071_v38, %v904_v17 }
 0x262   : > { %921 = vst.msk [vmem:[%s1477_s22 + $0x38] sm:$0xff] %vm913_vm13, %v910_v16  ;;  %v952_v19 = vmul.f32 %v910_v16, %v910_v16  ;;  %v935_v23 = vsel %vm913_vm13, %v910_v16, 0.0 }
 0x263   : > { %920 = vst.msk [vmem:[%s1477_s22 + $0x30] sm:$0xff] %vm913_vm13, %v905_v18  ;;  %v933_v20 = vsel %vm913_vm13, %v905_v18, 0.0  ;;  %v951_v21 = vmul.f32 %v905_v18, %v905_v18 }
 0x264   : > { %v934_v22 = vadd.f32 %v933_v20, %v932_v12  ;;  %v966_v27 = vsel %vm913_vm13, %v952_v19, 0.0 }
 0x265   : > { %v964_v24 = vsel %vm913_vm13, %v951_v21, 0.0 }
 0x266   : > { %v936_v25 = vadd.f32 %v935_v23, %v934_v22  ;;  %v965_v26 = vadd.f32 %v964_v24, %v963_v14 }
 0x268   : > { %v937_v28 = vrot.slane %v936_v25, 4  ;;  %v967_v29 = vadd.f32 %v966_v27, %v965_v26 }
 0x26a   : > { %v938_v30 = vadd.f32 %v937_v28, %v936_v25  ;;  %v968_v31 = vrot.slane %v967_v29, 4 }
 0x26c   : > { %v939_v32 = vrot.slane %v938_v30, 2  ;;  %v969_v33 = vadd.f32 %v968_v31, %v967_v29 }
 0x26e   : > { %v940_v34 = vadd.f32 %v939_v32, %v938_v30  ;;  %v970_v35 = vrot.slane %v969_v33, 2 }
 0x270   : > { %v941_v36 = vrot.slane %v940_v34, 1  ;;  %v971_v37 = vadd.f32 %v970_v35, %v969_v33 }
 0x272   : > { %v942_v38 = vadd.f32 %v941_v36, %v940_v34  ;;  %v972_v39 = vrot.slane %v971_v37, 1 }
 0x274   : > { %944 = vst.msk [vmem:[%s208_s26] sm:$0x1] %vm943_vm14, %v942_v38  ;;  %v973_v40 = vadd.f32 %v972_v39, %v971_v37 }
 0x276   : > { %974 = vst.msk [vmem:[%s208_s26 + $0x1] sm:$0x1] %vm943_vm14, %v973_v40 }
 0x277 PF: > { %s15_s15 = sadd.s32 1, %s1158_s15  }
 0x278   : > { %p12_p4 = scmp.ge.s32.totalorder %s15_s15, 4  }
 0x27a   :  { %14 = sbr.rel (!%p12_p4) target bundleno = 1 (0x1), region = 77 }

// kernel: down_forward.4
= control target key start
LH: loop header
LB: loop body
LE: loop exit
PB: predicated region body
PF: predicated region fallthrough
CT: control target
= control target key end

     0   :  { %s1278_s24 = smov 0   ;;  %s1579_s0 = inlined_call_operand.vmem [shape: f32[2,8,8,8], index: 0, kind: input, shape index: {}]   ;;  %s1580_s1 = inlined_call_operand.vmem [shape: f32[1,8], index: 1, kind: input, shape index: {}]   ;;  %s1581_s2 = inlined_call_operand.vmem [shape: f32[1,8], index: 2, kind: input, shape index: {}]   ;;  %s1582_s3 = inlined_call_operand.vmem [shape: f32[1,8], index: 3, kind: input, shape index: {}]   ;;  %s1583_s4 = inlined_call_operand.vmem [shape: f32[72,8], index: 4, kind: input, shape index: {}]   ;;  %s1584_s5 = inlined_call_operand.vmem [shape: f32[1,8], index: 5, kind: input, shape index: {}]   ;;  %s1585_s6 = inlined_call_operand.vmem [shape: f32[2,8,8,8], index: 6, kind: output, shape index: {0}]   ;;  %s1586_s7 = inlined_call_operand.vmem [shape: f32[2,2,8], index: 7, kind: output, shape index: {1}]  }
   0x1 LB: > { %s1105_s25 = sadd.s32 4294967295, %s1227_s24   ;;  %p1109_p0 = scmp.ge.s32.totalorder %s1227_s24, 1  ;;  %s1227_s24 = sphi %s1278_s24, %s18_s24  }
   0x2   : > { %p240_p1 = scmp.lt.s32.totalorder %s1227_s24, 3 }
   0x4   : > { %p241_p2 = pnand %p1109_p0, %p240_p1 }
   0x5   : > { %vm359_vm0 = vcmask (!%p241_p2), 64512   ;;  %vm361_vm1 = vcmask (!%p241_p2), 58368   ;;  %vm366_vm2 = vcmask (!%p241_p2), 57344   ;;  %v1229_v0 = vmov (!%p241_p2), 0.0   ;;  %p276_p3 = scmp.lt.s32.totalorder (!%p241_p2), %s1105_s25, 1  ;;  %s1230_s13 = smov (!%p241_p2), 8  }
   0x6   : > { %244 = sbr.rel (%p241_p2) target bundleno = 512 (0x200), region = 44  ;;  %360 = vst.msk [vmem:[#allocation2] sm:$0xff] (!%p241_p2), %vm359_vm0, %v1229_v0  ;;  %364 = vst.msk [vmem:[#allocation2 + $0x90] sm:$0xff] (!%p241_p2), %vm359_vm0, %v1229_v0  ;;  %v1115_v1 = vld [vmem:[%s1580_s1] ss:$0 sm:$0xff] (!%p241_p2)  ;;  %s1231_s14 = smov (!%p241_p2), 16  }
   0x7   : > { %362 = vst.msk [vmem:[#allocation2 + $0x8] sm:$0x3] (!%p241_p2), %vm361_vm1, %v1229_v0  ;;  %365 = vst.msk [vmem:[#allocation2 + $0x98] sm:$0x3] (!%p241_p2), %vm361_vm1, %v1229_v0  ;;  %v1116_v2 = vld [vmem:[%s1581_s2] ss:$0 sm:$0xff] (!%p241_p2) }
   0x8   : > { %368 = vst.msk [vmem:[#allocation2 + $0x10] sm:$0x1] (!%p241_p2), %vm366_vm2, %v1229_v0  ;;  %369 = vst.msk [vmem:[#allocation2 + $0x20] sm:$0x1] (!%p241_p2), %vm366_vm2, %v1229_v0  ;;  %v1117_v4 = vld [vmem:[%s1582_s3] ss:$0 sm:$0xff] (!%p241_p2) }
   0x9   : > { %370 = vst.msk [vmem:[#allocation2 + $0x30] sm:$0x1] (!%p241_p2), %vm366_vm2, %v1229_v0  ;;  %371 = vst.msk [vmem:[#allocation2 + $0x40] sm:$0x1] (!%p241_p2), %vm366_vm2, %v1229_v0  ;;  %s1232_s15 = smov (!%p241_p2), 24   ;;  %s1233_s16 = smov (!%p241_p2), 32  }
   0xa   : > { %372 = vst.msk [vmem:[#allocation2 + $0x50] sm:$0x1] (!%p241_p2), %vm366_vm2, %v1229_v0  ;;  %373 = vst.msk [vmem:[#allocation2 + $0x60] sm:$0x1] (!%p241_p2), %vm366_vm2, %v1229_v0  ;;  %s1234_s17 = smov (!%p241_p2), 40   ;;  %v813_v59 = vld [vmem:[%s1583_s4] sm:$0xff] (!%p241_p2) }
   0xb   : > { %374 = vst.msk [vmem:[#allocation2 + $0x70] sm:$0x1] (!%p241_p2), %vm366_vm2, %v1229_v0  ;;  %375 = vst.msk [vmem:[#allocation2 + $0x80] sm:$0x1] (!%p241_p2), %vm366_vm2, %v1229_v0  ;;  %v814_v60 = vld [vmem:[%s1583_s4 + $0x8] sm:$0xff] (!%p241_p2)  ;;  %s1235_s22 = smov (!%p241_p2), 48  }
   0xc   : > { %378 = vst.msk [vmem:[#allocation2 + $0x19] sm:$0x1] (!%p241_p2), %vm366_vm2, %v1229_v0  ;;  %379 = vst.msk [vmem:[#allocation2 + $0x29] sm:$0x1] (!%p241_p2), %vm366_vm2, %v1229_v0  ;;  %v1178_v61 = vpack.c.bf16 (!%p241_p2), %v814_v60, %v813_v59  ;;  %v815_v63 = vld [vmem:[%s1583_s4 + $0x10] sm:$0xff] (!%p241_p2)  ;;  %s1236_s11 = smov (!%p241_p2), 56  }
   0xd   : > { %380 = vst.msk [vmem:[#allocation2 + $0x39] sm:$0x1] %vm366_vm2, %v1229_v0  ;;  %381 = vst.msk [vmem:[#allocation2 + $0x49] sm:$0x1] %vm366_vm2, %v1229_v0  ;;  %s1588_s25 = smov (!%p276_p3, %s1105_s25), 1  ;;  %s1237_s27 = smov 64  }
   0xe   : > { %382 = vst.msk [vmem:[#allocation2 + $0x59] sm:$0x1] %vm366_vm2, %v1229_v0  ;;  %383 = vst.msk [vmem:[#allocation2 + $0x69] sm:$0x1] %vm366_vm2, %v1229_v0  ;;  %s1129_s26 = sshll.u32 %s1588_s25, 6  ;;  %v412_v7 = vld [vmem:[#allocation2 + $0x1] sm:$0xff]  ;;  %1179 = vmatprep.subr.bf16.mxu0 %v1178_v61  ;;  %1194 = vmatprep.subr.bf16.mxu1 %v1178_v61 }
   0xf   : > { %384 = vst.msk [vmem:[#allocation2 + $0x79] sm:$0x1] %vm366_vm2, %v1229_v0  ;;  %385 = vst.msk [vmem:[#allocation2 + $0x89] sm:$0x1] %vm366_vm2, %v1229_v0  ;;  %s280_s8 = scalar_lea.vmem %s1579_s0, %s1129_s26  ;;  %428 = vrot.lane.b32.xlu0 %v412_v7, %s1230_s13  ;;  %1181 = vmatpush3.bf16.msra.mxu0 %v1178_v61  ;;  %vm452_vm11 = vcmask 130112   ;;  %vm501_vm12 = vcmask 195712  }
  0x10   : > { %377 = vst.msk [vmem:[#allocation2 + $0x9] sm:$0x1] %vm366_vm2, %v1229_v0  ;;  %367 = vst.msk [vmem:[#allocation2] sm:$0x1] %vm366_vm2, %v1229_v0  ;;  %v290_v3 = vld [vmem:[%s280_s8] sm:$0xff]  ;;  %v291_v5 = vld [vmem:[%s280_s8 + $0x8] sm:$0xff]  ;;  %1199 = vmatpush3.bf16.msra.mxu1 %v1178_v61 }
  0x11   : > { %376 = vst.msk [vmem:[#allocation2 + $0x90] sm:$0x1] %vm366_vm2, %v1229_v0  ;;  %386 = vst.msk [vmem:[#allocation2 + $0x99] sm:$0x1] %vm366_vm2, %v1229_v0  ;;  %v292_v6 = vld [vmem:[%s280_s8 + $0x10] sm:$0xff]  ;;  %v305_v8 = vmul.f32 %v1115_v1, %v290_v3  ;;  %v306_v9 = vmul.f32 %v1115_v1, %v291_v5  ;;  %v293_v11 = vld [vmem:[%s280_s8 + $0x18] sm:$0xff] }
  0x12   : > { %v307_v10 = vmul.f32 %v1115_v1, %v292_v6  ;;  %v294_v12 = vld [vmem:[%s280_s8 + $0x20] sm:$0xff]  ;;  %v308_v14 = vmul.f32 %v1115_v1, %v293_v11  ;;  %v295_v16 = vld [vmem:[%s280_s8 + $0x28] sm:$0xff]  ;;  %v296_v17 = vld [vmem:[%s280_s8 + $0x30] sm:$0xff]  ;;  %vm550_vm13 = vcmask 261312   ;;  %vm599_vm14 = vcmask 326912  }
  0x13   : > { %v309_v15 = vmul.f32 %v1115_v1, %v294_v12  ;;  %v320_v18 = vadd.f32 %v1116_v2, %v305_v8  ;;  %v321_v19 = vadd.f32 %v1116_v2, %v306_v9  ;;  %v310_v21 = vmul.f32 %v1115_v1, %v295_v16  ;;  %v297_v22 = vld [vmem:[%s280_s8 + $0x38] sm:$0xff]  ;;  %v818_v3 = vld [vmem:[%s1583_s4 + $0x28] sm:$0xff]  ;;  %v819_v5 = vld [vmem:[%s1583_s4 + $0x30] sm:$0xff] }
  0x14   : > { %v322_v20 = vadd.f32 %v1116_v2, %v307_v10  ;;  %v323_v24 = vadd.f32 %v1116_v2, %v308_v14  ;;  %v311_v26 = vmul.f32 %v1115_v1, %v296_v17  ;;  %v312_v27 = vmul.f32 %v1115_v1, %v297_v22  ;;  %v816_v0 = vld [vmem:[%s1583_s4 + $0x18] sm:$0xff]  ;;  %v821_v8 = vld [vmem:[%s1583_s4 + $0x40] sm:$0xff] }
  0x15   : > { %v324_v25 = vadd.f32 %v1116_v2, %v309_v15  ;;  %vm328_vm3 = vcmp.ge.f32.partialorder %v320_v18, 0.0  ;;  %v343_v28 = vmul.f32 %v1117_v4, %v320_v18  ;;  %vm329_vm4 = vcmp.ge.f32.partialorder %v321_v19, 0.0  ;;  %v820_v6 = vld [vmem:[%s1583_s4 + $0x38] sm:$0xff] }
  0x16   : > { %v344_v29 = vmul.f32 %v1117_v4, %v321_v19  ;;  %vm330_vm5 = vcmp.ge.f32.partialorder %v322_v20, 0.0  ;;  %v345_v30 = vmul.f32 %v1117_v4, %v322_v20  ;;  %vm331_vm6 = vcmp.ge.f32.partialorder %v323_v24, 0.0 }
  0x17   : > { %v461_v13 = vld [vmem:[#allocation2 + $0x2] sm:$0xff]  ;;  %v346_v31 = vmul.f32 %v1117_v4, %v323_v24  ;;  %v351_v32 = vsel %vm328_vm3, %v320_v18, %v343_v28  ;;  %vm332_vm7 = vcmp.ge.f32.partialorder %v324_v25, 0.0  ;;  %v347_v34 = vmul.f32 %v1117_v4, %v324_v25 }
  0x18   : > { %477 = vrot.lane.b32.xlu1 %v461_v13, %s1231_s14  ;;  %v396_v23 = vld [vmem:[#allocation2] sm:$0xff]  ;;  %v352_v33 = vsel %vm329_vm4, %v321_v19, %v344_v29  ;;  %388 = vst.msk [vmem:[#allocation2 + $0x11] sm:$0xff] %vm359_vm0, %v351_v32  ;;  %v353_v35 = vsel %vm330_vm5, %v322_v20, %v345_v30  ;;  %v325_v37 = vadd.f32 %v1116_v2, %v310_v21  ;;  %v665_v22 = vld [vmem:[#allocation2 + $0x90] sm:$0xff]  ;;  %vm648_vm15 = vcmask 392512  }
  0x19   : > { %404 = vst.msk [vmem:[#allocation3] sm:$0xff] %vm359_vm0, %v396_v23  ;;  %389 = vst.msk [vmem:[#allocation2 + $0x21] sm:$0xff] %vm359_vm0, %v352_v33  ;;  %v354_v36 = vsel %vm331_vm6, %v323_v24, %v346_v31  ;;  %v326_v38 = vadd.f32 %v1116_v2, %v311_v26  ;;  %v355_v39 = vsel %vm332_vm7, %v324_v25, %v347_v34  ;;  %v714_v23 = vld [vmem:[#allocation2 + $0x91] sm:$0xff]  ;;  %vm698_vm1 = vcmask 458112  }
  0x1a   : > { %390 = vst.msk [vmem:[#allocation2 + $0x31] sm:$0xff] %vm359_vm0, %v353_v35  ;;  %391 = vst.msk [vmem:[#allocation2 + $0x41] sm:$0xff] %vm359_vm0, %v354_v36  ;;  %v327_v40 = vadd.f32 %v1116_v2, %v312_v27  ;;  %vm333_vm8 = vcmp.ge.f32.partialorder %v325_v37, 0.0  ;;  %v348_v41 = vmul.f32 %v1117_v4, %v325_v37  ;;  %v1182_v1 = vpack.c.bf16 %v816_v0, %v815_v63  ;;  %v817_v2 = vld [vmem:[%s1583_s4 + $0x20] sm:$0xff]  ;;  %v763_v26 = vld [vmem:[#allocation2 + $0x92] sm:$0xff] }
  0x1b   : > { %392 = vst.msk [vmem:[#allocation2 + $0x51] sm:$0xff] %vm359_vm0, %v355_v39  ;;  %vm334_vm9 = vcmp.ge.f32.partialorder %v326_v38, 0.0  ;;  %v349_v42 = vmul.f32 %v1117_v4, %v326_v38  ;;  %v1190_v7 = vpack.c.bf16 %v820_v6, %v819_v5  ;;  %vm747_vm3 = vcmask 523712  }
  0x1c   : > { %vm335_vm10 = vcmp.ge.f32.partialorder %v327_v40, 0.0  ;;  %v350_v43 = vmul.f32 %v1117_v4, %v327_v40  ;;  %v356_v44 = vsel %vm333_vm8, %v325_v37, %v348_v41  ;;  %1183 = vmatprep.subr.bf16.mxu0 %v1182_v1  ;;  %1195 = vmatprep.subr.bf16.mxu1 %v1182_v1  ;;  %v1186_v4 = vpack.c.bf16 %v818_v3, %v817_v2 }
  0x1d   : > { %v357_v45 = vsel %vm334_vm9, %v326_v38, %v349_v42  ;;  %393 = vst.msk [vmem:[#allocation2 + $0x61] sm:$0xff] %vm359_vm0, %v356_v44  ;;  %1185 = vmatpush3.bf16.msra.mxu0 %v1182_v1  ;;  %1200 = vmatpush3.bf16.msra.mxu1 %v1182_v1  ;;  %vm796_vm4 = vcmask 589312   ;;  %vm829_vm5 = vcmask 588800  }
  0x1e   : > { %394 = vst.msk [vmem:[#allocation2 + $0x71] sm:$0xff] %vm359_vm0, %v357_v45  ;;  %v358_v46 = vsel %vm335_vm10, %v327_v40, %v350_v43  ;;  %1187 = vmatprep.subr.bf16.mxu0 %v1186_v4  ;;  %1196 = vmatprep.subr.bf16.mxu1 %v1186_v4 }
  0x1f   : > { %395 = vst.msk [vmem:[#allocation2 + $0x81] sm:$0xff] %vm359_vm0, %v358_v46  ;;  %v462_v47 = vld [vmem:[#allocation2 + $0x12] sm:$0xff] }
  0x20   : > { %v413_v48 = vld [vmem:[#allocation2 + $0x11] sm:$0xff]  ;;  %v511_v49 = vld [vmem:[#allocation2 + $0x20] sm:$0xff]  ;;  %479 = vrot.lane.b32.xlu1 %v462_v47, %s1231_s14 }
  0x21   : > { %430 = vrot.lane.b32.xlu0 %v413_v48, %s1230_s13  ;;  %v510_v50 = vld [vmem:[#allocation2 + $0x10] sm:$0xff]  ;;  %406 = vst.msk [vmem:[#allocation3 + $0x10] sm:$0xff] %vm359_vm0, %v511_v49  ;;  %v1344_v52 = vld [vmem:[#allocation2 + $0x40] sm:$0xff]  ;;  %1189 = vmatpush3.bf16.msra.mxu0 %v1186_v4 }
  0x22   : > { %v512_v51 = vld [vmem:[#allocation2 + $0x30] sm:$0xff]  ;;  %405 = vst.msk [vmem:[#allocation3 + $0x8] sm:$0xff] %vm359_vm0, %v510_v50  ;;  %408 = vst.msk [vmem:[#allocation3 + $0x20] sm:$0xff] %vm359_vm0, %v1344_v52  ;;  %v414_v55 = vld [vmem:[#allocation2 + $0x21] sm:$0xff]  ;;  %1201 = vmatpush3.bf16.msra.mxu1 %v1186_v4  ;;  %1191 = vmatprep.subr.bf16.mxu0 %v1190_v7 }
  0x23   : > { %407 = vst.msk [vmem:[#allocation3 + $0x18] sm:$0xff] %vm359_vm0, %v512_v51  ;;  %v1347_v53 = vld [vmem:[#allocation2 + $0x50] sm:$0xff]  ;;  %v463_v57 = vld [vmem:[#allocation2 + $0x22] sm:$0xff]  ;;  %1197 = vmatprep.subr.bf16.mxu1 %v1190_v7 }
  0x24   : > { %528 = vrot.lane.b32.xlu1 %v511_v49, %s1232_s15  ;;  %v1353_v54 = vld [vmem:[#allocation2 + $0x60] sm:$0xff]  ;;  %409 = vst.msk [vmem:[#allocation3 + $0x28] sm:$0xff] %vm359_vm0, %v1347_v53  ;;  %v415_v58 = vld [vmem:[#allocation2 + $0x31] sm:$0xff] }
  0x25   : > { %526 = vrot.lane.b32.xlu0 %v510_v50, %s1232_s15  ;;  %v1357_v56 = vld [vmem:[#allocation2 + $0x70] sm:$0xff]  ;;  %410 = vst.msk [vmem:[#allocation3 + $0x30] sm:$0xff] %vm359_vm0, %v1353_v54  ;;  %1193 = vmatpush3.bf16.msra.mxu0 %v1190_v7  ;;  %v562_v9 = vld [vmem:[#allocation2 + $0x41] sm:$0xff] }
  0x26   : > { %411 = vst.msk [vmem:[#allocation3 + $0x38] sm:$0xff] %vm359_vm0, %v1357_v56  ;;  %v464_v62 = vld [vmem:[#allocation2 + $0x32] sm:$0xff]  ;;  %1202 = vmatpush3.bf16.msra.mxu1 %v1190_v7  ;;  %1164 = vmatprep.subr.mxu0 %v821_v8  ;;  %v465_v10 = vld [vmem:[#allocation2 + $0x42] sm:$0xff] }
  0x27   : > { %1198 = vmatprep.subr.mxu1 %v821_v8  ;;  %v417_v11 = vld [vmem:[#allocation2 + $0x51] sm:$0xff]  ;;  %v564_v13 = vld [vmem:[#allocation2 + $0x61] sm:$0xff] }
  0x28   : > { %432 = vrot.lane.b32.xlu1 %v414_v55, %s1230_s13  ;;  %v466_v12 = vld [vmem:[#allocation2 + $0x52] sm:$0xff]  ;;  %v467_v15 = vld [vmem:[#allocation2 + $0x62] sm:$0xff] }
  0x29   : > { %575 = vrot.lane.b32.xlu0 %v413_v48, %s1233_s16  ;;  %1165 = vmatpush3.msra.mxu0 %v821_v8  ;;  %v419_v14 = vld [vmem:[#allocation2 + $0x71] sm:$0xff]  ;;  %v517_v17 = vld [vmem:[#allocation2 + $0x80] sm:$0xff] }
  0x2a   : > { %1203 = vmatpush3.msra.mxu1 %v821_v8  ;;  %v468_v16 = vld [vmem:[#allocation2 + $0x72] sm:$0xff]  ;;  %v566_v19 = vld [vmem:[#allocation2 + $0x81] sm:$0xff] }
  0x2b   : > { %v615_v21 = vld [vmem:[#allocation2 + $0x82] sm:$0xff] }
  0x2c   : > { %624 = vrot.lane.b32.xlu1 %v462_v47, %s1234_s17 }
  0x2d   : > { %577 = vrot.lane.b32.xlu0 %v414_v55, %s1233_s16 }
  0x30   : > { %481 = vrot.lane.b32.xlu1 %v463_v57, %s1231_s14 }
  0x31   : > { %434 = vrot.lane.b32.xlu0 %v415_v58, %s1230_s13 }
  0x34   : > { %674 = vrot.lane.b32.xlu1 %v511_v49, %s1235_s22 }
  0x35   : > { %626 = vrot.lane.b32.xlu0 %v463_v57, %s1234_s17 }
  0x38   : > { %530 = vrot.lane.b32.xlu1 %v512_v51, %s1232_s15 }
  0x39   : > { %483 = vrot.lane.b32.xlu0 %v464_v62, %s1231_s14 }
  0x3c   : > { %723 = vrot.lane.b32.xlu1 %v414_v55, %s1236_s11 }
  0x3d   : > { %676 = vrot.lane.b32.xlu0 %v512_v51, %s1235_s22 }
  0x40   : > { %579 = vrot.lane.b32.xlu1 %v415_v58, %s1233_s16 }
  0x41   : > { %532 = vrot.lane.b32.xlu0 %v1344_v52, %s1232_s15 }
  0x44   : > { %772 = vrot.lane.b32.xlu1 %v463_v57, %s1237_s27 }
  0x45   : > { %725 = vrot.lane.b32.xlu0 %v415_v58, %s1236_s11 }
  0x48   : > { %581 = vrot.lane.b32.xlu1 %v562_v9, %s1233_s16 }
  0x49   : > { %436 = vrot.lane.b32.xlu0 %v562_v9, %s1230_s13 }
  0x4c   : > { %774 = vrot.lane.b32.xlu1 %v464_v62, %s1237_s27 }
  0x4d   : > { %628 = vrot.lane.b32.xlu0 %v464_v62, %s1234_s17 }
  0x50   : > { %485 = vrot.lane.b32.xlu1 %v465_v10, %s1231_s14 }
  0x51   : > { %438 = vrot.lane.b32.xlu0 %v417_v11, %s1230_s13 }
  0x54   : > { %678 = vrot.lane.b32.xlu1 %v1344_v52, %s1235_s22 }
  0x55   : > { %630 = vrot.lane.b32.xlu0 %v465_v10, %s1234_s17 }
  0x58   : > { %534 = vrot.lane.b32.xlu1 %v1347_v53, %s1232_s15 }
  0x59   : > { %487 = vrot.lane.b32.xlu0 %v466_v12, %s1231_s14 }
  0x5c   : > { %727 = vrot.lane.b32.xlu1 %v562_v9, %s1236_s11 }
  0x5d   : > { %680 = vrot.lane.b32.xlu0 %v1347_v53, %s1235_s22 }
  0x60   : > { %583 = vrot.lane.b32.xlu1 %v417_v11, %s1233_s16 }
  0x61   : > { %536 = vrot.lane.b32.xlu0 %v1353_v54, %s1232_s15 }
  0x64   : > { %776 = vrot.lane.b32.xlu1 %v465_v10, %s1237_s27 }
  0x65   : > { %729 = vrot.lane.b32.xlu0 %v417_v11, %s1236_s11 }
  0x68   : > { %585 = vrot.lane.b32.xlu1 %v564_v13, %s1233_s16 }
  0x69   : > { %440 = vrot.lane.b32.xlu0 %v564_v13, %s1230_s13 }
  0x6c   : > { %778 = vrot.lane.b32.xlu1 %v466_v12, %s1237_s27 }
  0x6d   : > { %632 = vrot.lane.b32.xlu0 %v466_v12, %s1234_s17 }
  0x70   : > { %489 = vrot.lane.b32.xlu1 %v467_v15, %s1231_s14 }
  0x71   : > { %442 = vrot.lane.b32.xlu0 %v419_v14, %s1230_s13 }
  0x74   : > { %682 = vrot.lane.b32.xlu1 %v1353_v54, %s1235_s22 }
  0x75   : > { %634 = vrot.lane.b32.xlu0 %v467_v15, %s1234_s17 }
  0x78   : > { %538 = vrot.lane.b32.xlu1 %v1357_v56, %s1232_s15 }
  0x79   : > { %491 = vrot.lane.b32.xlu0 %v468_v16, %s1231_s14 }
  0x7c   : > { %731 = vrot.lane.b32.xlu1 %v564_v13, %s1236_s11 }
  0x7d   : > { %684 = vrot.lane.b32.xlu0 %v1357_v56, %s1235_s22 }
  0x80   : > { %587 = vrot.lane.b32.xlu1 %v419_v14, %s1233_s16 }
  0x81   : > { %540 = vrot.lane.b32.xlu0 %v517_v17, %s1232_s15  ;;  %v429_v18 = vpop.permute.xlu0 %428 }
  0x82   : > { %453 = vst.msk [vmem:[#allocation3] sm:$0xff] %vm452_vm11, %v429_v18 }
  0x84   : > { %780 = vrot.lane.b32.xlu1 %v467_v15, %s1237_s27 }
  0x85   : > { %733 = vrot.lane.b32.xlu0 %v419_v14, %s1236_s11 }
  0x88   : > { %636 = vrot.lane.b32.xlu1 %v468_v16, %s1234_s17 }
  0x89   : > { %589 = vrot.lane.b32.xlu0 %v566_v19, %s1233_s16 }
  0x8a   : > { %v478_v20 = vpop.permute.xlu1 %477 }
  0x8b   : > { %502 = vst.msk [vmem:[#allocation3] sm:$0xff] %vm501_vm12, %v478_v20 }
  0x8c   : > { %638 = vrot.lane.b32.xlu1 %v615_v21, %s1234_s17  ;;  %s1536_s17 = scalar_lea.vmem %s1585_s6, %s1129_s26  ;;  %s1114_s26 = sshll.u32 %s1588_s25, 1 }
  0x8d   : > { %782 = vrot.lane.b32.xlu0 %v468_v16, %s1237_s27  ;;  %s289_s29 = scalar_lea.vmem %s1586_s7, %s1114_s26 }
  0x90   : > { %688 = vrot.lane.b32.xlu1 %v665_v22, %s1235_s22 }
  0x91   : > { %686 = vrot.lane.b32.xlu0 %v517_v17, %s1235_s22 }
  0x92   : > { %v480_v24 = vpop.permute.xlu1 %479 }
  0x93   : > { %v431_v25 = vpop.permute.xlu0 %430 }
  0x94   : > { %454 = vst.msk [vmem:[#allocation3 + $0x8] sm:$0xff] %vm452_vm11, %v431_v25  ;;  %737 = vrot.lane.b32.xlu1 %v714_v23, %s1236_s11 }
  0x95   : > { %735 = vrot.lane.b32.xlu0 %v566_v19, %s1236_s11  ;;  %503 = vst.msk [vmem:[#allocation3 + $0x8] sm:$0xff] %vm501_vm12, %v480_v24 }
  0x96   : > { %v529_v27 = vpop.permute.xlu1 %528 }
  0x97   : > { %v527_v28 = vpop.permute.xlu0 %526  ;;  %552 = vst.msk [vmem:[#allocation3 + $0x8] sm:$0xff] %vm550_vm13, %v529_v27 }
  0x98   : > { %551 = vst.msk [vmem:[#allocation3] sm:$0xff] %vm550_vm13, %v527_v28  ;;  %786 = vrot.lane.b32.xlu1 %v763_v26, %s1237_s27 }
  0x99   : > { %784 = vrot.lane.b32.xlu0 %v615_v21, %s1237_s27 }
  0x9a   : > { %v433_v29 = vpop.permute.xlu1 %432 }
  0x9b   : > { %v576_v30 = vpop.permute.xlu0 %575  ;;  %455 = vst.msk [vmem:[#allocation3 + $0x10] sm:$0xff] %vm452_vm11, %v433_v29 }
  0x9c   : > { %600 = vst.msk [vmem:[#allocation3] sm:$0xff] %vm599_vm14, %v576_v30 }
  0x9e   : > { %v625_v31 = vpop.permute.xlu1 %624 }
  0x9f   : > { %v578_v32 = vpop.permute.xlu0 %577  ;;  %649 = vst.msk [vmem:[#allocation3] sm:$0xff] %vm648_vm15, %v625_v31  ;;  %v1118_v31 = vld [vmem:[%s1584_s5] ss:$0 sm:$0xff] }
  0xa0   : > { %601 = vst.msk [vmem:[#allocation3 + $0x8] sm:$0xff] %vm599_vm14, %v578_v32 }
  0xa2   : > { %v482_v33 = vpop.permute.xlu1 %481 }
  0xa3   : > { %v435_v34 = vpop.permute.xlu0 %434  ;;  %504 = vst.msk [vmem:[#allocation3 + $0x10] sm:$0xff] %vm501_vm12, %v482_v33 }
  0xa4   : > { %456 = vst.msk [vmem:[#allocation3 + $0x18] sm:$0xff] %vm452_vm11, %v435_v34 }
  0xa6   : > { %v675_v35 = vpop.permute.xlu1 %674 }
  0xa7   : > { %v627_v36 = vpop.permute.xlu0 %626  ;;  %699 = vst.msk [vmem:[#allocation3] sm:$0xff] %vm698_vm1, %v675_v35 }
  0xa8   : > { %650 = vst.msk [vmem:[#allocation3 + $0x8] sm:$0xff] %vm648_vm15, %v627_v36 }
  0xaa   : > { %v531_v37 = vpop.permute.xlu1 %530 }
  0xab   : > { %v484_v38 = vpop.permute.xlu0 %483  ;;  %553 = vst.msk [vmem:[#allocation3 + $0x10] sm:$0xff] %vm550_vm13, %v531_v37 }
  0xac   : > { %505 = vst.msk [vmem:[#allocation3 + $0x18] sm:$0xff] %vm501_vm12, %v484_v38 }
  0xae   : > { %v724_v39 = vpop.permute.xlu1 %723 }
  0xaf   : > { %v677_v40 = vpop.permute.xlu0 %676  ;;  %748 = vst.msk [vmem:[#allocation3] sm:$0xff] %vm747_vm3, %v724_v39 }
  0xb0   : > { %700 = vst.msk [vmem:[#allocation3 + $0x8] sm:$0xff] %vm698_vm1, %v677_v40 }
  0xb2   : > { %v580_v41 = vpop.permute.xlu1 %579 }
  0xb3   : > { %v533_v42 = vpop.permute.xlu0 %532  ;;  %602 = vst.msk [vmem:[#allocation3 + $0x10] sm:$0xff] %vm599_vm14, %v580_v41 }
  0xb4   : > { %554 = vst.msk [vmem:[#allocation3 + $0x18] sm:$0xff] %vm550_vm13, %v533_v42 }
  0xb6   : > { %v773_v43 = vpop.permute.xlu1 %772 }
  0xb7   : > { %v726_v44 = vpop.permute.xlu0 %725  ;;  %797 = vst.msk [vmem:[#allocation3] sm:$0xff] %vm796_vm4, %v773_v43 }
  0xb8   : > { %749 = vst.msk [vmem:[#allocation3 + $0x8] sm:$0xff] %vm747_vm3, %v726_v44 }
  0xba   : > { %v582_v45 = vpop.permute.xlu1 %581 }
  0xbb   : > { %v437_v46 = vpop.permute.xlu0 %436  ;;  %603 = vst.msk [vmem:[#allocation3 + $0x18] sm:$0xff] %vm599_vm14, %v582_v45 }
  0xbc   : > { %457 = vst.msk [vmem:[#allocation3 + $0x20] sm:$0xff] %vm452_vm11, %v437_v46 }
  0xbe   : > { %v775_v47 = vpop.permute.xlu1 %774  ;;  %v805_v49 = vld [vmem:[#allocation3] sm:$0xff] }
  0xbf   : > { %v629_v48 = vpop.permute.xlu0 %628  ;;  %798 = vst.msk [vmem:[#allocation3 + $0x8] sm:$0xff] %vm796_vm4, %v775_v47  ;;  %1166 = vmatprep.mubr.msk.f32.mxu0 %vm829_vm5, %v805_v49 }
  0xc0   : > { %651 = vst.msk [vmem:[#allocation3 + $0x10] sm:$0xff] %vm648_vm15, %v629_v48 }
  0xc2   : > { %v486_v50 = vpop.permute.xlu1 %485 }
  0xc3   : > { %v439_v51 = vpop.permute.xlu0 %438  ;;  %506 = vst.msk [vmem:[#allocation3 + $0x20] sm:$0xff] %vm501_vm12, %v486_v50 }
  0xc4   : > { %458 = vst.msk [vmem:[#allocation3 + $0x28] sm:$0xff] %vm452_vm11, %v439_v51 }
  0xc6   : > { %v679_v52 = vpop.permute.xlu1 %678  ;;  %v806_v54 = vld [vmem:[#allocation3 + $0x8] sm:$0xff] }
  0xc7   : > { %v631_v53 = vpop.permute.xlu0 %630  ;;  %701 = vst.msk [vmem:[#allocation3 + $0x10] sm:$0xff] %vm698_vm1, %v679_v52  ;;  %1167 = vmatmul.mubr.msk.f32.vlgmr.msra.gmra.mrb[0].mxu0 %vm829_vm5, %v806_v54 }
  0xc8   : > { %652 = vst.msk [vmem:[#allocation3 + $0x18] sm:$0xff] %vm648_vm15, %v631_v53 }
  0xca   : > { %v535_v55 = vpop.permute.xlu1 %534 }
  0xcb   : > { %v488_v56 = vpop.permute.xlu0 %487  ;;  %555 = vst.msk [vmem:[#allocation3 + $0x20] sm:$0xff] %vm550_vm13, %v535_v55 }
  0xcc   : > { %507 = vst.msk [vmem:[#allocation3 + $0x28] sm:$0xff] %vm501_vm12, %v488_v56 }
  0xce   : > { %v728_v57 = vpop.permute.xlu1 %727 }
  0xcf   : > { %v681_v58 = vpop.permute.xlu0 %680  ;;  %750 = vst.msk [vmem:[#allocation3 + $0x10] sm:$0xff] %vm747_vm3, %v728_v57 }
  0xd0   : > { %702 = vst.msk [vmem:[#allocation3 + $0x18] sm:$0xff] %vm698_vm1, %v681_v58 }
  0xd2   : > { %v584_v59 = vpop.permute.xlu1 %583 }
  0xd3   : > { %v537_v60 = vpop.permute.xlu0 %536  ;;  %604 = vst.msk [vmem:[#allocation3 + $0x20] sm:$0xff] %vm599_vm14, %v584_v59 }
  0xd4   : > { %556 = vst.msk [vmem:[#allocation3 + $0x28] sm:$0xff] %vm550_vm13, %v537_v60 }
  0xd6   : > { %v777_v61 = vpop.permute.xlu1 %776 }
  0xd7   : > { %v730_v62 = vpop.permute.xlu0 %729  ;;  %799 = vst.msk [vmem:[#allocation3 + $0x10] sm:$0xff] %vm796_vm4, %v777_v61 }
  0xd8   : > { %751 = vst.msk [vmem:[#allocation3 + $0x18] sm:$0xff] %vm747_vm3, %v730_v62 }
  0xda   : > { %v586_v63 = vpop.permute.xlu1 %585 }
  0xdb   : > { %v441_v0 = vpop.permute.xlu0 %440  ;;  %605 = vst.msk [vmem:[#allocation3 + $0x28] sm:$0xff] %vm599_vm14, %v586_v63 }
  0xdc   : > { %459 = vst.msk [vmem:[#allocation3 + $0x30] sm:$0xff] %vm452_vm11, %v441_v0 }
  0xde   : > { %v779_v1 = vpop.permute.xlu1 %778  ;;  %v807_v3 = vld [vmem:[#allocation3 + $0x10] sm:$0xff] }
  0xdf   : > { %v633_v2 = vpop.permute.xlu0 %632  ;;  %800 = vst.msk [vmem:[#allocation3 + $0x18] sm:$0xff] %vm796_vm4, %v779_v1  ;;  %1169 = vmatprep.mubr.msk.f32.mxu0 %vm829_vm5, %v807_v3 }
  0xe0   : > { %653 = vst.msk [vmem:[#allocation3 + $0x20] sm:$0xff] %vm648_vm15, %v633_v2 }
  0xe2   : > { %v490_v5 = vpop.permute.xlu1 %489 }
  0xe3   : > { %v443_v4 = vpop.permute.xlu0 %442  ;;  %508 = vst.msk [vmem:[#allocation3 + $0x30] sm:$0xff] %vm501_vm12, %v490_v5 }
  0xe4   : > { %460 = vst.msk [vmem:[#allocation3 + $0x38] sm:$0xff] %vm452_vm11, %v443_v4 }
  0xe6   : > { %v683_v7 = vpop.permute.xlu1 %682  ;;  %v808_v8 = vld [vmem:[#allocation3 + $0x18] sm:$0xff] }
  0xe7   : > { %v635_v6 = vpop.permute.xlu0 %634  ;;  %703 = vst.msk [vmem:[#allocation3 + $0x20] sm:$0xff] %vm698_vm1, %v683_v7  ;;  %1170 = vmatmul.mubr.msk.f32.gmra.mrb[2].mxu0 %vm829_vm5, %v808_v8 }
  0xe8   : > { %654 = vst.msk [vmem:[#allocation3 + $0x28] sm:$0xff] %vm648_vm15, %v635_v6 }
  0xea   : > { %v539_v10 = vpop.permute.xlu1 %538 }
  0xeb   : > { %v492_v9 = vpop.permute.xlu0 %491  ;;  %557 = vst.msk [vmem:[#allocation3 + $0x30] sm:$0xff] %vm550_vm13, %v539_v10 }
  0xec   : > { %509 = vst.msk [vmem:[#allocation3 + $0x38] sm:$0xff] %vm501_vm12, %v492_v9 }
  0xee   : > { %v732_v12 = vpop.permute.xlu1 %731 }
  0xef   : > { %v685_v11 = vpop.permute.xlu0 %684  ;;  %752 = vst.msk [vmem:[#allocation3 + $0x20] sm:$0xff] %vm747_vm3, %v732_v12 }
  0xf0   : > { %704 = vst.msk [vmem:[#allocation3 + $0x28] sm:$0xff] %vm698_vm1, %v685_v11 }
  0xf2   : > { %v588_v14 = vpop.permute.xlu1 %587 }
  0xf3   : > { %v541_v13 = vpop.permute.xlu0 %540  ;;  %606 = vst.msk [vmem:[#allocation3 + $0x30] sm:$0xff] %vm599_vm14, %v588_v14 }
  0xf4   : > { %558 = vst.msk [vmem:[#allocation3 + $0x38] sm:$0xff] %vm550_vm13, %v541_v13 }
  0xf6   : > { %v781_v16 = vpop.permute.xlu1 %780 }
  0xf7   : > { %v734_v15 = vpop.permute.xlu0 %733  ;;  %801 = vst.msk [vmem:[#allocation3 + $0x20] sm:$0xff] %vm796_vm4, %v781_v16 }
  0xf8   : > { %753 = vst.msk [vmem:[#allocation3 + $0x28] sm:$0xff] %vm747_vm3, %v734_v15 }
  0xfa   : > { %v637_v18 = vpop.permute.xlu1 %636 }
  0xfb   : > { %v590_v17 = vpop.permute.xlu0 %589  ;;  %655 = vst.msk [vmem:[#allocation3 + $0x30] sm:$0xff] %vm648_vm15, %v637_v18 }
  0xfc   : > { %607 = vst.msk [vmem:[#allocation3 + $0x38] sm:$0xff] %vm599_vm14, %v590_v17 }
  0xfe   : > { %v639_v20 = vpop.permute.xlu1 %638  ;;  %v809_v21 = vld [vmem:[#allocation3 + $0x20] sm:$0xff] }
  0xff   : > { %v783_v19 = vpop.permute.xlu0 %782  ;;  %656 = vst.msk [vmem:[#allocation3 + $0x38] sm:$0xff] %vm648_vm15, %v639_v20  ;;  %1172 = vmatprep.mubr.msk.f32.mxu1 %vm829_vm5, %v809_v21 }
 0x100   : > { %802 = vst.msk [vmem:[#allocation3 + $0x28] sm:$0xff] %vm796_vm4, %v783_v19 }
 0x102   : > { %v689_v23 = vpop.permute.xlu1 %688 }
 0x103   : > { %v687_v22 = vpop.permute.xlu0 %686  ;;  %706 = vst.msk [vmem:[#allocation3 + $0x38] sm:$0xff] %vm698_vm1, %v689_v23 }
 0x104   : > { %705 = vst.msk [vmem:[#allocation3 + $0x30] sm:$0xff] %vm698_vm1, %v687_v22 }
 0x106   : > { %v738_v25 = vpop.permute.xlu1 %737 }
 0x107   : > { %v736_v24 = vpop.permute.xlu0 %735  ;;  %v810_v26 = vld [vmem:[#allocation3 + $0x28] sm:$0xff]  ;;  %755 = vst.msk [vmem:[#allocation3 + $0x38] sm:$0xff] %vm747_vm3, %v738_v25 }
 0x108   : > { %754 = vst.msk [vmem:[#allocation3 + $0x30] sm:$0xff] %vm747_vm3, %v736_v24  ;;  %1173 = vmatmul.mubr.msk.f32.vlgmr.msra.gmra.mrb[0].mxu1 %vm829_vm5, %v810_v26 }
 0x10a   : > { %v787_v28 = vpop.permute.xlu1 %786 }
 0x10b   : > { %v785_v27 = vpop.permute.xlu0 %784  ;;  %804 = vst.msk [vmem:[#allocation3 + $0x38] sm:$0xff] %vm796_vm4, %v787_v28 }
 0x10c   : > { %803 = vst.msk [vmem:[#allocation3 + $0x30] sm:$0xff] %vm796_vm4, %v785_v27 }
 0x112   : > { %v812_v30 = vld [vmem:[#allocation3 + $0x38] sm:$0xff] }
 0x113   : > { %v811_v29 = vld [vmem:[#allocation3 + $0x30] sm:$0xff] }
 0x114   : > { %1175 = vmatprep.mubr.msk.f32.mxu1 %vm829_vm5, %v811_v29 }
 0x115   : > { %1176 = vmatmul.mubr.msk.f32.gmra.mrb[2].mxu1 %vm829_vm5, %v812_v30 }
 0x19a   : > { %v1168_v32 = vpop.f32.mrb[0].mxu0 }
 0x19b   : > { %v926_v33 = vadd.f32 %v1168_v32, %v1118_v31  ;;  %v920_v34 = vpop.f32.mrb[1].mxu0 }
 0x19c   : > { %v921_v35 = vadd.f32 %v1118_v31, %v920_v34 }
 0x19d   : > { %960 = vst.msk [vmem:[%s1536_s17 + $0x8] sm:$0xff] %vm359_vm0, %v926_v33  ;;  %v968_v36 = vsel %vm359_vm0, %v926_v33, 0.0  ;;  %v990_v37 = vmul.f32 %v926_v33, %v926_v33 }
 0x19e   : > { %959 = vst.msk [vmem:[%s1536_s17] sm:$0xff] %vm359_vm0, %v921_v35  ;;  %v967_v38 = vsel %vm359_vm0, %v921_v35, 0.0  ;;  %v989_v39 = vmul.f32 %v921_v35, %v921_v35 }
 0x19f   : > { %v998_v40 = vsel %vm359_vm0, %v990_v37, 0.0  ;;  %v969_v41 = vadd.f32 %v968_v36, %v967_v38 }
 0x1a0   : > { %v997_v42 = vsel %vm359_vm0, %v989_v39, 0.0 }
 0x1a1   : > { %v999_v43 = vadd.f32 %v998_v40, %v997_v42 }
 0x1ba   : > { %v1171_v44 = vpop.f32.mrb[2].mxu0 }
 0x1bb   : > { %v936_v45 = vadd.f32 %v1171_v44, %v1118_v31  ;;  %v930_v46 = vpop.f32.mrb[3].mxu0 }
 0x1bc   : > { %v931_v47 = vadd.f32 %v1118_v31, %v930_v46 }
 0x1bd   : > { %962 = vst.msk [vmem:[%s1536_s17 + $0x18] sm:$0xff] %vm359_vm0, %v936_v45  ;;  %v992_v48 = vmul.f32 %v936_v45, %v936_v45  ;;  %v972_v52 = vsel %vm359_vm0, %v936_v45, 0.0 }
 0x1be   : > { %961 = vst.msk [vmem:[%s1536_s17 + $0x10] sm:$0xff] %vm359_vm0, %v931_v47  ;;  %v970_v49 = vsel %vm359_vm0, %v931_v47, 0.0  ;;  %v991_v50 = vmul.f32 %v931_v47, %v931_v47 }
 0x1bf   : > { %v971_v51 = vadd.f32 %v970_v49, %v969_v41  ;;  %v1002_v56 = vsel %vm359_vm0, %v992_v48, 0.0 }
 0x1c0   : > { %v1000_v53 = vsel %vm359_vm0, %v991_v50, 0.0 }
 0x1c1   : > { %v1001_v54 = vadd.f32 %v1000_v53, %v999_v43  ;;  %v973_v55 = vadd.f32 %v972_v52, %v971_v51 }
 0x1c3   : > { %v1003_v57 = vadd.f32 %v1002_v56, %v1001_v54 }
 0x1db   : > { %v1174_v58 = vpop.f32.mrb[0].mxu1 }
 0x1dc   : > { %v946_v59 = vadd.f32 %v1174_v58, %v1118_v31  ;;  %v940_v60 = vpop.f32.mrb[1].mxu1 }
 0x1dd   : > { %v941_v61 = vadd.f32 %v1118_v31, %v940_v60 }
 0x1de   : > { %964 = vst.msk [vmem:[%s1536_s17 + $0x28] sm:$0xff] %vm359_vm0, %v946_v59  ;;  %v994_v62 = vmul.f32 %v946_v59, %v946_v59  ;;  %v976_v2 = vsel %vm359_vm0, %v946_v59, 0.0 }
 0x1df   : > { %963 = vst.msk [vmem:[%s1536_s17 + $0x20] sm:$0xff] %vm359_vm0, %v941_v61  ;;  %v974_v63 = vsel %vm359_vm0, %v941_v61, 0.0  ;;  %v993_v0 = vmul.f32 %v941_v61, %v941_v61 }
 0x1e0   : > { %v975_v1 = vadd.f32 %v974_v63, %v973_v55  ;;  %v1006_v6 = vsel %vm359_vm0, %v994_v62, 0.0 }
 0x1e1   : > { %v1004_v3 = vsel %vm359_vm0, %v993_v0, 0.0 }
 0x1e2   : > { %v1005_v4 = vadd.f32 %v1004_v3, %v1003_v57  ;;  %v977_v5 = vadd.f32 %v976_v2, %v975_v1 }
 0x1e4   : > { %v1007_v7 = vadd.f32 %v1006_v6, %v1005_v4 }
 0x1e8   : > { %v1177_v8 = vpop.f32.mrb[2].mxu1 }
 0x1e9   : > { %v956_v9 = vadd.f32 %v1177_v8, %v1118_v31  ;;  %v950_v10 = vpop.f32.mrb[3].mxu1 }
 0x1ea   : > { %v951_v11 = vadd.f32 %v1118_v31, %v950_v10 }
 0x1eb   : > { %966 = vst.msk [vmem:[%s1536_s17 + $0x38] sm:$0xff] %vm359_vm0, %v956_v9  ;;  %v996_v12 = vmul.f32 %v956_v9, %v956_v9  ;;  %v980_v16 = vsel %vm359_vm0, %v956_v9, 0.0 }
 0x1ec   : > { %965 = vst.msk [vmem:[%s1536_s17 + $0x30] sm:$0xff] %vm359_vm0, %v951_v11  ;;  %v978_v13 = vsel %vm359_vm0, %v951_v11, 0.0  ;;  %v995_v14 = vmul.f32 %v951_v11, %v951_v11 }
 0x1ed   : > { %v979_v15 = vadd.f32 %v978_v13, %v977_v5  ;;  %v1010_v20 = vsel %vm359_vm0, %v996_v12, 0.0 }
 0x1ee   : > { %v1008_v17 = vsel %vm359_vm0, %v995_v14, 0.0 }
 0x1ef   : > { %v981_v18 = vadd.f32 %v980_v16, %v979_v15  ;;  %v1009_v19 = vadd.f32 %v1008_v17, %v1007_v7 }
 0x1f1   : > { %v982_v21 = vrot.slane %v981_v18, 4  ;;  %v1011_v22 = vadd.f32 %v1010_v20, %v1009_v19 }
 0x1f3   : > { %v983_v23 = vadd.f32 %v982_v21, %v981_v18  ;;  %v1012_v24 = vrot.slane %v1011_v22, 4 }
 0x1f5   : > { %v984_v25 = vrot.slane %v983_v23, 2  ;;  %v1013_v26 = vadd.f32 %v1012_v24, %v1011_v22 }
 0x1f7   : > { %v985_v27 = vadd.f32 %v984_v25, %v983_v23  ;;  %v1014_v28 = vrot.slane %v1013_v26, 2 }
 0x1f9   : > { %v986_v29 = vrot.slane %v985_v27, 1  ;;  %v1015_v30 = vadd.f32 %v1014_v28, %v1013_v26 }
 0x1fb   : > { %v987_v31 = vadd.f32 %v986_v29, %v985_v27  ;;  %v1016_v32 = vrot.slane %v1015_v30, 1 }
 0x1fd   : > { %988 = vst.msk [vmem:[%s289_s29] sm:$0x1] %vm366_vm2, %v987_v31  ;;  %v1017_v33 = vadd.f32 %v1016_v32, %v1015_v30 }
 0x1ff   : > { %1018 = vst.msk [vmem:[%s289_s29 + $0x1] sm:$0x1] %vm366_vm2, %v1017_v33 }
 0x200 PF: > { %s18_s24 = sadd.s32 1, %s1227_s24  }
 0x201   : > { %p15_p4 = scmp.ge.s32.totalorder %s18_s24, 4  }
 0x203   :  { %17 = sbr.rel (!%p15_p4) target bundleno = 1 (0x1), region = 89 }

</bundles_post_ra>
